<compile_context>
chip_gen: v7x
topology: tpu7x:2x2x1
jax: 0.10.0
libtpu: 0.0.40
codegen_flags: <defaults>
</compile_context>

<pallas_src>
import jax
import jax.numpy as jnp
from jax.experimental import pallas as pl
from jax.experimental.pallas import tpu as pltpu

CP = 128            # lane-padded channel width (all channel dims padded to this)
LEAKY_SLOPE = 0.01  # nn.LeakyReLU default


# ---------------------------------------------------------------------------
# Fused whole-model kernel
# ---------------------------------------------------------------------------
def _make_fused_kernel(dilations, cins, has_down, *, K, T, slope):
    """Builds the fused kernel for a static block structure.

    dilations[b]      : dilation of block b
    cins[b]           : (conv1 in-channels, conv2 in-channels) of block b
    has_down[b]       : whether block b has a 1x1 downsample on the residual
    """
    n_blocks = len(dilations)

    def kernel(*refs):
        # -------- unpack refs: inputs..., output ---------------------------
        idx = 0
        x_ref = refs[idx]; idx += 1
        blocks = []
        for b in range(n_blocks):
            w1, b1, w2, b2 = refs[idx], refs[idx + 1], refs[idx + 2], refs[idx + 3]
            idx += 4
            if has_down[b]:
                wd, bd = refs[idx], refs[idx + 1]
                idx += 2
            else:
                wd, bd = None, None
            blocks.append((w1, b1, w2, b2, wd, bd))
        l1w, l1b, l2w, l2b = refs[idx], refs[idx + 1], refs[idx + 2], refs[idx + 3]
        idx += 4
        o_ref = refs[idx]

        N = o_ref.shape[0]  # rows in this tile (= whole batches * T)
        # time index of every flattened row (rows are batch-major within the
        # tile) — zeroes causally-invalid rows of each shifted tap and kills
        # cross-batch leakage from the sublane roll.
        t_idx = jax.lax.broadcasted_iota(jnp.int32, (N, CP), 0) % T

        def causal_dilated_conv(val, w_ref, b_ref, dilation, cin):
            """val: (N, CP) f32 activation -> (N, CP) f32 conv pre-activation.

            Lane-packs the K dilated taps: weight tap j (time shift
            (K-1-j)*dilation) occupies lanes [j*cin, (j+1)*cin) of a single
            (N, 128) operand.  Padded lanes of `val` are exactly zero, so the
            roll wraparound (both sublane and lane) contributes nothing.
            """
            operand = None
            for j in range(K):                      # static unroll over taps
                shift = (K - 1 - j) * dilation
                if shift == 0:
                    tap = val
                else:
                    tap = jnp.where(t_idx >= shift,
                                    pltpu.roll(val, shift, axis=0), 0.0)
                if j * cin:
                    tap = pltpu.roll(tap, j * cin, axis=1)
                operand = tap if operand is None else operand + tap
            acc = jnp.dot(operand.astype(jnp.bfloat16), w_ref[...],
                          preferred_element_type=jnp.float32)
            return acc + b_ref[...]

        cur = x_ref[...]
        for b, (w1, b1, w2, b2, wd, bd) in enumerate(blocks):
            d = dilations[b]
            cin1, cin2 = cins[b]
            h = jnp.maximum(causal_dilated_conv(cur, w1, b1, d, cin1), 0.0)
            o = jnp.maximum(causal_dilated_conv(h, w2, b2, d, cin2), 0.0)
            if wd is not None:                      # 1x1 downsample residual
                res = jnp.dot(cur.astype(jnp.bfloat16), wd[...],
                              preferred_element_type=jnp.float32) + bd[...]
            else:
                res = cur
            cur = jnp.maximum(o + res, 0.0)

        # MLP head: l2(LeakyReLU(l1(x)))
        h = jnp.dot(cur.astype(jnp.bfloat16), l1w[...],
                    preferred_element_type=jnp.float32) + l1b[...]
        h = jnp.where(h > 0, h, slope * h)
        y = jnp.dot(h.astype(jnp.bfloat16), l2w[...],
                    preferred_element_type=jnp.float32) + l2b[...]
        o_ref[...] = y.astype(o_ref.dtype)

    return kernel


# ---------------------------------------------------------------------------
# Wrapper
# ---------------------------------------------------------------------------
def _pick_batch_tile(B, T, target_rows=512):
    """Largest #batches per tile with rows <= target and a legal block shape."""
    cands = [bb for bb in range(1, B + 1)
             if B % bb == 0 and bb * T <= target_rows
             and ((bb * T) % 8 == 0 or bb == B)]
    return max(cands) if cands else B


def hypersphere_forward(params, x, config):
    """x: (B, T, input_dim) -> (B, T, hidden_dim[-1]); params = padded params."""
    B, T, Cin = x.shape
    K = config["kernel_size"]
    hidden = config["hidden_dim"]
    H = hidden[-1]
    n_blocks = len(hidden)
    dilations = tuple(2 ** i for i in range(n_blocks))
    cins = tuple(((Cin if i == 0 else hidden[i - 1]), hidden[i])
                 for i in range(n_blocks))
    N = B * T

    # lane-pad the input once (tiny); everything downstream stays in VMEM/vregs
    x_flat = jnp.zeros((N, CP), jnp.float32).at[:, :Cin].set(
        x.reshape(N, Cin).astype(jnp.float32))

    flat_args = [x_flat]
    has_down = []
    for blk in params["blocks"]:
        flat_args += [blk["w1"], blk["b1"], blk["w2"], blk["b2"]]
        hd = blk["wd"] is not None
        has_down.append(hd)
        if hd:
            flat_args += [blk["wd"], blk["bd"]]
    flat_args += [params["l1_w"], params["l1_b"], params["l2_w"], params["l2_b"]]

    # batch-tiled grid (whole batches per tile => causal conv needs no halo)
    bb = _pick_batch_tile(B, T)
    rows = bb * T
    grid = (B // bb,)

    in_specs = [pl.BlockSpec((rows, CP), lambda i: (i, 0))]
    # weights/biases: full-array blocks, constant index_map => resident across steps
    in_specs += [pl.BlockSpec(a.shape, lambda i: (0, 0)) for a in flat_args[1:]]
    out_specs = pl.BlockSpec((rows, CP), lambda i: (i, 0))

    n_matmuls = sum(2 + (1 if hd else 0) for hd in has_down) + 2
    flops = 2 * N * CP * CP * n_matmuls
    bytes_accessed = (sum(int(a.size) * a.dtype.itemsize for a in flat_args)
                      + N * CP * 4)

    kernel = _make_fused_kernel(dilations, cins, tuple(has_down),
                                K=K, T=T, slope=LEAKY_SLOPE)
    y = pl.pallas_call(
        kernel,
        grid=grid,
        in_specs=in_specs,
        out_specs=out_specs,
        out_shape=jax.ShapeDtypeStruct((N, CP), jnp.float32),
        compiler_params=pltpu.CompilerParams(
            dimension_semantics=("parallel",)),
        cost_estimate=pl.CostEstimate(
            flops=flops, transcendentals=0, bytes_accessed=bytes_accessed),
    )(*flat_args)
    return y[:, :H].reshape(B, T, H)


# ---------------------------------------------------------------------------
# Parameters: raw (for reference) + padded/folded bf16 (for the kernel)
# ---------------------------------------------------------------------------
def _pad_to(a, shape, dtype=jnp.float32):
    out = jnp.zeros(shape, jnp.float32)
    out = out.at[tuple(slice(0, s) for s in a.shape)].set(a)
    return out.astype(dtype)


def init_params(key, config):
    input_dim = config["input_dim"]
    hidden = config["hidden_dim"]
    K = config["kernel_size"]
    use_bias = config["tcn_bias"]

    def nxt(k):
        return jax.random.split(k)

    raw_blocks, pallas_blocks = [], []
    for i, out_ch in enumerate(hidden):
        in_ch = input_dim if i == 0 else hidden[i - 1]
        key, k1 = nxt(key); key, k2 = nxt(key)
        key, kb1 = nxt(key); key, kb2 = nxt(key)
        # conv weights ~ N(0, 0.01) as in TemporalBlock.init_weights; stored (K, Cin, Cout)
        w1 = 0.01 * jax.random.normal(k1, (K, in_ch, out_ch), jnp.float32)
        w2 = 0.01 * jax.random.normal(k2, (K, out_ch, out_ch), jnp.float32)
        if use_bias:
            b1 = 0.1 * jax.random.normal(kb1, (out_ch,), jnp.float32)
            b2 = 0.1 * jax.random.normal(kb2, (out_ch,), jnp.float32)
        else:
            b1 = jnp.zeros((out_ch,), jnp.float32)
            b2 = jnp.zeros((out_ch,), jnp.float32)
        if in_ch != out_ch:
            key, kd = nxt(key); key, kdb = nxt(key)
            wd = 0.01 * jax.random.normal(kd, (in_ch, out_ch), jnp.float32)
            bd = 0.1 * jax.random.normal(kdb, (out_ch,), jnp.float32)
        else:
            wd, bd = None, None
        raw_blocks.append({"w1": w1, "b1": b1, "w2": w2, "b2": b2, "wd": wd, "bd": bd})

        def fold(w):  # (K, Cin, Cout) -> lane-packed bf16 (CP, CP)
            Kk, cin, cout = w.shape
            # TODO(synk): if K*Cin > 128, fall back to K accumulated dots against
            #             per-tap weight slices instead of lane-packing.
            assert Kk * cin <= CP, "lane-packed conv fold requires K*Cin <= 128"
            wp = jnp.zeros((CP, CP), jnp.float32)
            for j in range(Kk):
                wp = wp.at[j * cin:(j + 1) * cin, :cout].set(w[j])
            return wp.astype(jnp.bfloat16)

        pallas_blocks.append({
            "w1": fold(w1), "b1": _pad_to(b1[None, :], (1, CP)),
            "w2": fold(w2), "b2": _pad_to(b2[None, :], (1, CP)),
            "wd": None if wd is None else _pad_to(wd, (CP, CP), jnp.bfloat16),
            "bd": None if bd is None else _pad_to(bd[None, :], (1, CP)),
        })

    H = hidden[-1]
    bound = 1.0 / (H ** 0.5)
    key, kl1 = nxt(key); key, kl2 = nxt(key)
    key, kb1 = nxt(key); key, kb2 = nxt(key)
    l1_w = jax.random.uniform(kl1, (H, H), jnp.float32, -bound, bound)
    l2_w = jax.random.uniform(kl2, (H, H), jnp.float32, -bound, bound)
    l1_b = jax.random.uniform(kb1, (H,), jnp.float32, -bound, bound)
    l2_b = jax.random.uniform(kb2, (H,), jnp.float32, -bound, bound)

    raw = {"blocks": raw_blocks, "l1_w": l1_w, "l1_b": l1_b, "l2_w": l2_w, "l2_b": l2_b}
    pallas = {
        "blocks": pallas_blocks,
        "l1_w": _pad_to(l1_w, (CP, CP), jnp.bfloat16),
        "l1_b": _pad_to(l1_b[None, :], (1, CP)),
        "l2_w": _pad_to(l2_w, (CP, CP), jnp.bfloat16),
        "l2_b": _pad_to(l2_b[None, :], (1, CP)),
    }
    return {"raw": raw, "pallas": pallas}


# ---------------------------------------------------------------------------
# Pure-JAX reference (eval-mode PyTorch semantics) for a correctness check
# ---------------------------------------------------------------------------
def _ref_causal_conv(x, w, b, d):
    K, _, Cout = w.shape
    B, T, _ = x.shape
    pad = (K - 1) * d
    xp = jnp.pad(x, ((0, 0), (pad, 0), (0, 0)))
    y = jnp.broadcast_to(b, (B, T, Cout)).astype(jnp.float32)
    for j in range(K):
        y = y + jnp.einsum("btc,co->bto", xp[:, j * d: j * d + T, :], w[j],
                           precision=jax.lax.Precision.HIGHEST)
    return y


def reference_forward(raw, x, config):
    out = x.astype(jnp.float32)
    for i, blk in enumerate(raw["blocks"]):
        d = 2 ** i
        h = jax.nn.relu(_ref_causal_conv(out, blk["w1"], blk["b1"], d))
        o = jax.nn.relu(_ref_causal_conv(h, blk["w2"], blk["b2"], d))
        if blk["wd"] is not None:
            res = jnp.einsum("btc,co->bto", out, blk["wd"],
                             precision=jax.lax.Precision.HIGHEST) + blk["bd"]
        else:
            res = out
        out = jax.nn.relu(o + res)
    h = jnp.einsum("bth,ho->bto", out, raw["l1_w"],
                   precision=jax.lax.Precision.HIGHEST) + raw["l1_b"]
    h = jnp.where(h > 0, h, 0.01 * h)
    y = jnp.einsum("bth,ho->bto", h, raw["l2_w"],
                   precision=jax.lax.Precision.HIGHEST) + raw["l2_b"]
    return y


if __name__ == "__main__":
    config = {
        "input_dim": 4,
        "hidden_dim": [8, 16],
        "kernel_size": 3,
        "tcn_bias": True,
        "dropout": 0.2,   # identity in eval-mode forward
    }
    key = jax.random.PRNGKey(0)
    key, kx = jax.random.split(key)
    x = jax.random.normal(kx, (2, 16, config["input_dim"]), jnp.float32)  # (B, T, C)

    params = init_params(key, config)

    fwd = jax.jit(lambda p, xx: hypersphere_forward(p, xx, config))
    out = jax.block_until_ready(fwd(params["pallas"], x))
    assert out.shape == (2, 16, config["hidden_dim"][-1])

    ref = jax.block_until_ready(reference_forward(params["raw"], x, config))
    max_err = float(jnp.max(jnp.abs(out - ref)))
    # bf16 MXU operands => slightly looser than the f32 check, still catches
    # any layout / causality / tap-packing bug (those produce O(0.1) errors).
    assert jnp.allclose(out, ref, rtol=2e-2, atol=8e-3), max_err

    print("KERNEL_OK")
</pallas_src>

<mosaic_0001>
module attributes {stable_mosaic.version = 11 : i64} {
  func.func @kernel(%arg0: i32, %arg1: memref<32x128xf32, #tpu.memory_space<vmem>>, %arg2: memref<128x128xbf16, #tpu.memory_space<vmem>>, %arg3: memref<1x128xf32, #tpu.memory_space<vmem>>, %arg4: memref<128x128xbf16, #tpu.memory_space<vmem>>, %arg5: memref<1x128xf32, #tpu.memory_space<vmem>>, %arg6: memref<128x128xbf16, #tpu.memory_space<vmem>>, %arg7: memref<1x128xf32, #tpu.memory_space<vmem>>, %arg8: memref<128x128xbf16, #tpu.memory_space<vmem>>, %arg9: memref<1x128xf32, #tpu.memory_space<vmem>>, %arg10: memref<128x128xbf16, #tpu.memory_space<vmem>>, %arg11: memref<1x128xf32, #tpu.memory_space<vmem>>, %arg12: memref<128x128xbf16, #tpu.memory_space<vmem>>, %arg13: memref<1x128xf32, #tpu.memory_space<vmem>>, %arg14: memref<128x128xbf16, #tpu.memory_space<vmem>>, %arg15: memref<1x128xf32, #tpu.memory_space<vmem>>, %arg16: memref<128x128xbf16, #tpu.memory_space<vmem>>, %arg17: memref<1x128xf32, #tpu.memory_space<vmem>>, %arg18: memref<32x128xf32, #tpu.memory_space<vmem>>) attributes {dimension_semantics = [#tpu.dimension_semantics<parallel>], iteration_bounds = array<i64: 1>, scalar_prefetch = 0 : i64, scratch_operands = 0 : i64, tpu.core_type = #tpu.core_type<tc>, window_params = [{transform_indices = @transform_0, window_bounds = array<i64: 32, 128>}, {pipeline_mode = #tpu.pipeline_mode<synchronous>, transform_indices = @transform_1, window_bounds = array<i64: 128, 128>}, {pipeline_mode = #tpu.pipeline_mode<synchronous>, transform_indices = @transform_2, window_bounds = array<i64: 1, 128>}, {pipeline_mode = #tpu.pipeline_mode<synchronous>, transform_indices = @transform_3, window_bounds = array<i64: 128, 128>}, {pipeline_mode = #tpu.pipeline_mode<synchronous>, transform_indices = @transform_4, window_bounds = array<i64: 1, 128>}, {pipeline_mode = #tpu.pipeline_mode<synchronous>, transform_indices = @transform_5, window_bounds = array<i64: 128, 128>}, {pipeline_mode = #tpu.pipeline_mode<synchronous>, transform_indices = @transform_6, window_bounds = array<i64: 1, 128>}, {pipeline_mode = #tpu.pipeline_mode<synchronous>, transform_indices = @transform_7, window_bounds = array<i64: 128, 128>}, {pipeline_mode = #tpu.pipeline_mode<synchronous>, transform_indices = @transform_8, window_bounds = array<i64: 1, 128>}, {pipeline_mode = #tpu.pipeline_mode<synchronous>, transform_indices = @transform_9, window_bounds = array<i64: 128, 128>}, {pipeline_mode = #tpu.pipeline_mode<synchronous>, transform_indices = @transform_10, window_bounds = array<i64: 1, 128>}, {pipeline_mode = #tpu.pipeline_mode<synchronous>, transform_indices = @transform_11, window_bounds = array<i64: 128, 128>}, {pipeline_mode = #tpu.pipeline_mode<synchronous>, transform_indices = @transform_12, window_bounds = array<i64: 1, 128>}, {pipeline_mode = #tpu.pipeline_mode<synchronous>, transform_indices = @transform_13, window_bounds = array<i64: 128, 128>}, {pipeline_mode = #tpu.pipeline_mode<synchronous>, transform_indices = @transform_14, window_bounds = array<i64: 1, 128>}, {pipeline_mode = #tpu.pipeline_mode<synchronous>, transform_indices = @transform_15, window_bounds = array<i64: 128, 128>}, {pipeline_mode = #tpu.pipeline_mode<synchronous>, transform_indices = @transform_16, window_bounds = array<i64: 1, 128>}, {transform_indices = @transform_17, window_bounds = array<i64: 32, 128>}]} {
    %0 = tpu.iota {dimensions = array<i32: 0>} : vector<32x128xi32>
    %c16_i32 = arith.constant 16 : i32
    %c0_i32 = arith.constant 0 : i32
    %1 = arith.cmpi eq, %c16_i32, %c0_i32 : i32
    %c1_i32 = arith.constant 1 : i32
    %2 = arith.select %1, %c1_i32, %c16_i32 : i32
    %3 = vector.broadcast %2 : i32 to vector<32x128xi32>
    %4 = arith.remsi %0, %3 : vector<32x128xi32>
    %c0_i32_0 = arith.constant 0 : i32
    %5 = vector.broadcast %c0_i32_0 : i32 to vector<32x128xi32>
    %6 = arith.cmpi ne, %4, %5 : vector<32x128xi32>
    %c0_i32_1 = arith.constant 0 : i32
    %7 = vector.broadcast %c0_i32_1 : i32 to vector<32x128xi32>
    %8 = arith.cmpi slt, %4, %7 : vector<32x128xi32>
    %c0_i32_2 = arith.constant 0 : i32
    %9 = arith.cmpi slt, %2, %c0_i32_2 : i32
    %10 = vector.broadcast %9 : i1 to vector<32x128xi1>
    %11 = vector.broadcast %10 : vector<32x128xi1> to vector<32x128xi1>
    %12 = arith.xori %8, %11 : vector<32x128xi1>
    %13 = arith.andi %12, %6 : vector<32x128xi1>
    %14 = vector.broadcast %2 : i32 to vector<32x128xi32>
    %15 = arith.addi %4, %14 : vector<32x128xi32>
    %16 = arith.select %13, %15, %4 : vector<32x128xi1>, vector<32x128xi32>
    %c0 = arith.constant 0 : index
    %c0_3 = arith.constant 0 : index
    %17 = vector.load %arg1[%c0, %c0_3] : memref<32x128xf32, #tpu.memory_space<vmem>>, vector<32x128xf32>
    %c2_i32 = arith.constant 2 : i32
    %18 = vector.broadcast %c2_i32 : i32 to vector<32x128xi32>
    %19 = arith.cmpi sge, %16, %18 : vector<32x128xi32>
    %c2_i32_4 = arith.constant 2 : i32
    %20 = tpu.dynamic_rotate %17 by %c2_i32_4 dim 0 : vector<32x128xf32>, i32 -> vector<32x128xf32>
    %cst = arith.constant 0.000000e+00 : f32
    %21 = vector.broadcast %cst : f32 to vector<32x128xf32>
    %22 = arith.select %19, %20, %21 : vector<32x128xi1>, vector<32x128xf32>
    %c1_i32_5 = arith.constant 1 : i32
    %23 = vector.broadcast %c1_i32_5 : i32 to vector<32x128xi32>
    %24 = arith.cmpi sge, %16, %23 : vector<32x128xi32>
    %c1_i32_6 = arith.constant 1 : i32
    %25 = tpu.dynamic_rotate %17 by %c1_i32_6 dim 0 : vector<32x128xf32>, i32 -> vector<32x128xf32>
    %cst_7 = arith.constant 0.000000e+00 : f32
    %26 = vector.broadcast %cst_7 : f32 to vector<32x128xf32>
    %27 = arith.select %24, %25, %26 : vector<32x128xi1>, vector<32x128xf32>
    %c4_i32 = arith.constant 4 : i32
    %28 = tpu.dynamic_rotate %27 by %c4_i32 dim 1 : vector<32x128xf32>, i32 -> vector<32x128xf32>
    %29 = arith.addf %22, %28 : vector<32x128xf32>
    %c8_i32 = arith.constant 8 : i32
    %30 = tpu.dynamic_rotate %17 by %c8_i32 dim 1 : vector<32x128xf32>, i32 -> vector<32x128xf32>
    %31 = arith.addf %29, %30 : vector<32x128xf32>
    %32 = arith.truncf %31 : vector<32x128xf32> to vector<32x128xbf16>
    %c0_8 = arith.constant 0 : index
    %c0_9 = arith.constant 0 : index
    %33 = vector.load %arg2[%c0_8, %c0_9] : memref<128x128xbf16, #tpu.memory_space<vmem>>, vector<128x128xbf16>
    %cst_10 = arith.constant dense<0.000000e+00> : vector<32x128xf32>
    %34 = tpu.matmul %32, %33, %cst_10 {dimension_numbers = #tpu.dot_dimension_numbers<[1], [0], [0], [1], [0, 0, 1, 1], [], []>} : vector<32x128xbf16>, vector<128x128xbf16>, vector<32x128xf32> -> vector<32x128xf32>
    %c0_11 = arith.constant 0 : index
    %c0_12 = arith.constant 0 : index
    %35 = vector.load %arg3[%c0_11, %c0_12] : memref<1x128xf32, #tpu.memory_space<vmem>>, vector<1x128xf32>
    %36 = vector.broadcast %35 : vector<1x128xf32> to vector<32x128xf32>
    %37 = arith.addf %34, %36 : vector<32x128xf32>
    %cst_13 = arith.constant 0.000000e+00 : f32
    %38 = vector.broadcast %cst_13 : f32 to vector<32x128xf32>
    %39 = arith.maximumf %37, %38 : vector<32x128xf32>
    %c2_i32_14 = arith.constant 2 : i32
    %40 = vector.broadcast %c2_i32_14 : i32 to vector<32x128xi32>
    %41 = arith.cmpi sge, %16, %40 : vector<32x128xi32>
    %c2_i32_15 = arith.constant 2 : i32
    %42 = tpu.dynamic_rotate %39 by %c2_i32_15 dim 0 : vector<32x128xf32>, i32 -> vector<32x128xf32>
    %cst_16 = arith.constant 0.000000e+00 : f32
    %43 = vector.broadcast %cst_16 : f32 to vector<32x128xf32>
    %44 = arith.select %41, %42, %43 : vector<32x128xi1>, vector<32x128xf32>
    %c1_i32_17 = arith.constant 1 : i32
    %45 = vector.broadcast %c1_i32_17 : i32 to vector<32x128xi32>
    %46 = arith.cmpi sge, %16, %45 : vector<32x128xi32>
    %c1_i32_18 = arith.constant 1 : i32
    %47 = tpu.dynamic_rotate %39 by %c1_i32_18 dim 0 : vector<32x128xf32>, i32 -> vector<32x128xf32>
    %cst_19 = arith.constant 0.000000e+00 : f32
    %48 = vector.broadcast %cst_19 : f32 to vector<32x128xf32>
    %49 = arith.select %46, %47, %48 : vector<32x128xi1>, vector<32x128xf32>
    %c8_i32_20 = arith.constant 8 : i32
    %50 = tpu.dynamic_rotate %49 by %c8_i32_20 dim 1 : vector<32x128xf32>, i32 -> vector<32x128xf32>
    %51 = arith.addf %44, %50 : vector<32x128xf32>
    %c16_i32_21 = arith.constant 16 : i32
    %52 = tpu.dynamic_rotate %39 by %c16_i32_21 dim 1 : vector<32x128xf32>, i32 -> vector<32x128xf32>
    %53 = arith.addf %51, %52 : vector<32x128xf32>
    %54 = arith.truncf %53 : vector<32x128xf32> to vector<32x128xbf16>
    %c0_22 = arith.constant 0 : index
    %c0_23 = arith.constant 0 : index
    %55 = vector.load %arg4[%c0_22, %c0_23] : memref<128x128xbf16, #tpu.memory_space<vmem>>, vector<128x128xbf16>
    %cst_24 = arith.constant dense<0.000000e+00> : vector<32x128xf32>
    %56 = tpu.matmul %54, %55, %cst_24 {dimension_numbers = #tpu.dot_dimension_numbers<[1], [0], [0], [1], [0, 0, 1, 1], [], []>} : vector<32x128xbf16>, vector<128x128xbf16>, vector<32x128xf32> -> vector<32x128xf32>
    %c0_25 = arith.constant 0 : index
    %c0_26 = arith.constant 0 : index
    %57 = vector.load %arg5[%c0_25, %c0_26] : memref<1x128xf32, #tpu.memory_space<vmem>>, vector<1x128xf32>
    %58 = vector.broadcast %57 : vector<1x128xf32> to vector<32x128xf32>
    %59 = arith.addf %56, %58 : vector<32x128xf32>
    %cst_27 = arith.constant 0.000000e+00 : f32
    %60 = vector.broadcast %cst_27 : f32 to vector<32x128xf32>
    %61 = arith.maximumf %59, %60 : vector<32x128xf32>
    %62 = arith.truncf %17 : vector<32x128xf32> to vector<32x128xbf16>
    %c0_28 = arith.constant 0 : index
    %c0_29 = arith.constant 0 : index
    %63 = vector.load %arg6[%c0_28, %c0_29] : memref<128x128xbf16, #tpu.memory_space<vmem>>, vector<128x128xbf16>
    %cst_30 = arith.constant dense<0.000000e+00> : vector<32x128xf32>
    %64 = tpu.matmul %62, %63, %cst_30 {dimension_numbers = #tpu.dot_dimension_numbers<[1], [0], [0], [1], [0, 0, 1, 1], [], []>} : vector<32x128xbf16>, vector<128x128xbf16>, vector<32x128xf32> -> vector<32x128xf32>
    %c0_31 = arith.constant 0 : index
    %c0_32 = arith.constant 0 : index
    %65 = vector.load %arg7[%c0_31, %c0_32] : memref<1x128xf32, #tpu.memory_space<vmem>>, vector<1x128xf32>
    %66 = vector.broadcast %65 : vector<1x128xf32> to vector<32x128xf32>
    %67 = arith.addf %64, %66 : vector<32x128xf32>
    %68 = arith.addf %61, %67 : vector<32x128xf32>
    %cst_33 = arith.constant 0.000000e+00 : f32
    %69 = vector.broadcast %cst_33 : f32 to vector<32x128xf32>
    %70 = arith.maximumf %68, %69 : vector<32x128xf32>
    %c4_i32_34 = arith.constant 4 : i32
    %71 = vector.broadcast %c4_i32_34 : i32 to vector<32x128xi32>
    %72 = arith.cmpi sge, %16, %71 : vector<32x128xi32>
    %c4_i32_35 = arith.constant 4 : i32
    %73 = tpu.dynamic_rotate %70 by %c4_i32_35 dim 0 : vector<32x128xf32>, i32 -> vector<32x128xf32>
    %cst_36 = arith.constant 0.000000e+00 : f32
    %74 = vector.broadcast %cst_36 : f32 to vector<32x128xf32>
    %75 = arith.select %72, %73, %74 : vector<32x128xi1>, vector<32x128xf32>
    %c2_i32_37 = arith.constant 2 : i32
    %76 = vector.broadcast %c2_i32_37 : i32 to vector<32x128xi32>
    %77 = arith.cmpi sge, %16, %76 : vector<32x128xi32>
    %c2_i32_38 = arith.constant 2 : i32
    %78 = tpu.dynamic_rotate %70 by %c2_i32_38 dim 0 : vector<32x128xf32>, i32 -> vector<32x128xf32>
    %cst_39 = arith.constant 0.000000e+00 : f32
    %79 = vector.broadcast %cst_39 : f32 to vector<32x128xf32>
    %80 = arith.select %77, %78, %79 : vector<32x128xi1>, vector<32x128xf32>
    %c8_i32_40 = arith.constant 8 : i32
    %81 = tpu.dynamic_rotate %80 by %c8_i32_40 dim 1 : vector<32x128xf32>, i32 -> vector<32x128xf32>
    %82 = arith.addf %75, %81 : vector<32x128xf32>
    %c16_i32_41 = arith.constant 16 : i32
    %83 = tpu.dynamic_rotate %70 by %c16_i32_41 dim 1 : vector<32x128xf32>, i32 -> vector<32x128xf32>
    %84 = arith.addf %82, %83 : vector<32x128xf32>
    %85 = arith.truncf %84 : vector<32x128xf32> to vector<32x128xbf16>
    %c0_42 = arith.constant 0 : index
    %c0_43 = arith.constant 0 : index
    %86 = vector.load %arg8[%c0_42, %c0_43] : memref<128x128xbf16, #tpu.memory_space<vmem>>, vector<128x128xbf16>
    %cst_44 = arith.constant dense<0.000000e+00> : vector<32x128xf32>
    %87 = tpu.matmul %85, %86, %cst_44 {dimension_numbers = #tpu.dot_dimension_numbers<[1], [0], [0], [1], [0, 0, 1, 1], [], []>} : vector<32x128xbf16>, vector<128x128xbf16>, vector<32x128xf32> -> vector<32x128xf32>
    %c0_45 = arith.constant 0 : index
    %c0_46 = arith.constant 0 : index
    %88 = vector.load %arg9[%c0_45, %c0_46] : memref<1x128xf32, #tpu.memory_space<vmem>>, vector<1x128xf32>
    %89 = vector.broadcast %88 : vector<1x128xf32> to vector<32x128xf32>
    %90 = arith.addf %87, %89 : vector<32x128xf32>
    %cst_47 = arith.constant 0.000000e+00 : f32
    %91 = vector.broadcast %cst_47 : f32 to vector<32x128xf32>
    %92 = arith.maximumf %90, %91 : vector<32x128xf32>
    %c4_i32_48 = arith.constant 4 : i32
    %93 = vector.broadcast %c4_i32_48 : i32 to vector<32x128xi32>
    %94 = arith.cmpi sge, %16, %93 : vector<32x128xi32>
    %c4_i32_49 = arith.constant 4 : i32
    %95 = tpu.dynamic_rotate %92 by %c4_i32_49 dim 0 : vector<32x128xf32>, i32 -> vector<32x128xf32>
    %cst_50 = arith.constant 0.000000e+00 : f32
    %96 = vector.broadcast %cst_50 : f32 to vector<32x128xf32>
    %97 = arith.select %94, %95, %96 : vector<32x128xi1>, vector<32x128xf32>
    %c2_i32_51 = arith.constant 2 : i32
    %98 = vector.broadcast %c2_i32_51 : i32 to vector<32x128xi32>
    %99 = arith.cmpi sge, %16, %98 : vector<32x128xi32>
    %c2_i32_52 = arith.constant 2 : i32
    %100 = tpu.dynamic_rotate %92 by %c2_i32_52 dim 0 : vector<32x128xf32>, i32 -> vector<32x128xf32>
    %cst_53 = arith.constant 0.000000e+00 : f32
    %101 = vector.broadcast %cst_53 : f32 to vector<32x128xf32>
    %102 = arith.select %99, %100, %101 : vector<32x128xi1>, vector<32x128xf32>
    %c16_i32_54 = arith.constant 16 : i32
    %103 = tpu.dynamic_rotate %102 by %c16_i32_54 dim 1 : vector<32x128xf32>, i32 -> vector<32x128xf32>
    %104 = arith.addf %97, %103 : vector<32x128xf32>
    %c32_i32 = arith.constant 32 : i32
    %105 = tpu.dynamic_rotate %92 by %c32_i32 dim 1 : vector<32x128xf32>, i32 -> vector<32x128xf32>
    %106 = arith.addf %104, %105 : vector<32x128xf32>
    %107 = arith.truncf %106 : vector<32x128xf32> to vector<32x128xbf16>
    %c0_55 = arith.constant 0 : index
    %c0_56 = arith.constant 0 : index
    %108 = vector.load %arg10[%c0_55, %c0_56] : memref<128x128xbf16, #tpu.memory_space<vmem>>, vector<128x128xbf16>
    %cst_57 = arith.constant dense<0.000000e+00> : vector<32x128xf32>
    %109 = tpu.matmul %107, %108, %cst_57 {dimension_numbers = #tpu.dot_dimension_numbers<[1], [0], [0], [1], [0, 0, 1, 1], [], []>} : vector<32x128xbf16>, vector<128x128xbf16>, vector<32x128xf32> -> vector<32x128xf32>
    %c0_58 = arith.constant 0 : index
    %c0_59 = arith.constant 0 : index
    %110 = vector.load %arg11[%c0_58, %c0_59] : memref<1x128xf32, #tpu.memory_space<vmem>>, vector<1x128xf32>
    %111 = vector.broadcast %110 : vector<1x128xf32> to vector<32x128xf32>
    %112 = arith.addf %109, %111 : vector<32x128xf32>
    %cst_60 = arith.constant 0.000000e+00 : f32
    %113 = vector.broadcast %cst_60 : f32 to vector<32x128xf32>
    %114 = arith.maximumf %112, %113 : vector<32x128xf32>
    %115 = arith.truncf %70 : vector<32x128xf32> to vector<32x128xbf16>
    %c0_61 = arith.constant 0 : index
    %c0_62 = arith.constant 0 : index
    %116 = vector.load %arg12[%c0_61, %c0_62] : memref<128x128xbf16, #tpu.memory_space<vmem>>, vector<128x128xbf16>
    %cst_63 = arith.constant dense<0.000000e+00> : vector<32x128xf32>
    %117 = tpu.matmul %115, %116, %cst_63 {dimension_numbers = #tpu.dot_dimension_numbers<[1], [0], [0], [1], [0, 0, 1, 1], [], []>} : vector<32x128xbf16>, vector<128x128xbf16>, vector<32x128xf32> -> vector<32x128xf32>
    %c0_64 = arith.constant 0 : index
    %c0_65 = arith.constant 0 : index
    %118 = vector.load %arg13[%c0_64, %c0_65] : memref<1x128xf32, #tpu.memory_space<vmem>>, vector<1x128xf32>
    %119 = vector.broadcast %118 : vector<1x128xf32> to vector<32x128xf32>
    %120 = arith.addf %117, %119 : vector<32x128xf32>
    %121 = arith.addf %114, %120 : vector<32x128xf32>
    %cst_66 = arith.constant 0.000000e+00 : f32
    %122 = vector.broadcast %cst_66 : f32 to vector<32x128xf32>
    %123 = arith.maximumf %121, %122 : vector<32x128xf32>
    %124 = arith.truncf %123 : vector<32x128xf32> to vector<32x128xbf16>
    %c0_67 = arith.constant 0 : index
    %c0_68 = arith.constant 0 : index
    %125 = vector.load %arg14[%c0_67, %c0_68] : memref<128x128xbf16, #tpu.memory_space<vmem>>, vector<128x128xbf16>
    %cst_69 = arith.constant dense<0.000000e+00> : vector<32x128xf32>
    %126 = tpu.matmul %124, %125, %cst_69 {dimension_numbers = #tpu.dot_dimension_numbers<[1], [0], [0], [1], [0, 0, 1, 1], [], []>} : vector<32x128xbf16>, vector<128x128xbf16>, vector<32x128xf32> -> vector<32x128xf32>
    %c0_70 = arith.constant 0 : index
    %c0_71 = arith.constant 0 : index
    %127 = vector.load %arg15[%c0_70, %c0_71] : memref<1x128xf32, #tpu.memory_space<vmem>>, vector<1x128xf32>
    %128 = vector.broadcast %127 : vector<1x128xf32> to vector<32x128xf32>
    %129 = arith.addf %126, %128 : vector<32x128xf32>
    %cst_72 = arith.constant 0.000000e+00 : f32
    %130 = vector.broadcast %cst_72 : f32 to vector<32x128xf32>
    %131 = arith.cmpf ogt, %129, %130 : vector<32x128xf32>
    %cst_73 = arith.constant 0.00999999977 : f32
    %132 = vector.broadcast %cst_73 : f32 to vector<32x128xf32>
    %133 = arith.mulf %132, %129 : vector<32x128xf32>
    %134 = arith.select %131, %129, %133 : vector<32x128xi1>, vector<32x128xf32>
    %135 = arith.truncf %134 : vector<32x128xf32> to vector<32x128xbf16>
    %c0_74 = arith.constant 0 : index
    %c0_75 = arith.constant 0 : index
    %136 = vector.load %arg16[%c0_74, %c0_75] : memref<128x128xbf16, #tpu.memory_space<vmem>>, vector<128x128xbf16>
    %cst_76 = arith.constant dense<0.000000e+00> : vector<32x128xf32>
    %137 = tpu.matmul %135, %136, %cst_76 {dimension_numbers = #tpu.dot_dimension_numbers<[1], [0], [0], [1], [0, 0, 1, 1], [], []>} : vector<32x128xbf16>, vector<128x128xbf16>, vector<32x128xf32> -> vector<32x128xf32>
    %c0_77 = arith.constant 0 : index
    %c0_78 = arith.constant 0 : index
    %138 = vector.load %arg17[%c0_77, %c0_78] : memref<1x128xf32, #tpu.memory_space<vmem>>, vector<1x128xf32>
    %139 = vector.broadcast %138 : vector<1x128xf32> to vector<32x128xf32>
    %140 = arith.addf %137, %139 : vector<32x128xf32>
    %c0_79 = arith.constant 0 : index
    %c0_80 = arith.constant 0 : index
    %141 = vector.load %arg18[%c0_79, %c0_80] : memref<32x128xf32, #tpu.memory_space<vmem>>, vector<32x128xf32>
    tpu.vector_store %arg18[%c0_79, %c0_80], %140 {strides = array<i32>} : memref<32x128xf32, #tpu.memory_space<vmem>>, vector<32x128xf32>,
    return
  }
  func.func @transform_0(%arg0: i32) -> (i32, i32) {
    %c0_i32 = arith.constant 0 : i32
    %c0_i32_0 = arith.constant 0 : i32
    return %arg0, %c0_i32 : i32, i32
  }
  func.func @transform_1(%arg0: i32) -> (i32, i32) {
    %c0_i32 = arith.constant 0 : i32
    %c0_i32_0 = arith.constant 0 : i32
    %c0_i32_1 = arith.constant 0 : i32
    return %c0_i32, %c0_i32_0 : i32, i32
  }
  func.func @transform_2(%arg0: i32) -> (i32, i32) {
    %c0_i32 = arith.constant 0 : i32
    %c0_i32_0 = arith.constant 0 : i32
    %c0_i32_1 = arith.constant 0 : i32
    return %c0_i32, %c0_i32_0 : i32, i32
  }
  func.func @transform_3(%arg0: i32) -> (i32, i32) {
    %c0_i32 = arith.constant 0 : i32
    %c0_i32_0 = arith.constant 0 : i32
    %c0_i32_1 = arith.constant 0 : i32
    return %c0_i32, %c0_i32_0 : i32, i32
  }
  func.func @transform_4(%arg0: i32) -> (i32, i32) {
    %c0_i32 = arith.constant 0 : i32
    %c0_i32_0 = arith.constant 0 : i32
    %c0_i32_1 = arith.constant 0 : i32
    return %c0_i32, %c0_i32_0 : i32, i32
  }
  func.func @transform_5(%arg0: i32) -> (i32, i32) {
    %c0_i32 = arith.constant 0 : i32
    %c0_i32_0 = arith.constant 0 : i32
    %c0_i32_1 = arith.constant 0 : i32
    return %c0_i32, %c0_i32_0 : i32, i32
  }
  func.func @transform_6(%arg0: i32) -> (i32, i32) {
    %c0_i32 = arith.constant 0 : i32
    %c0_i32_0 = arith.constant 0 : i32
    %c0_i32_1 = arith.constant 0 : i32
    return %c0_i32, %c0_i32_0 : i32, i32
  }
  func.func @transform_7(%arg0: i32) -> (i32, i32) {
    %c0_i32 = arith.constant 0 : i32
    %c0_i32_0 = arith.constant 0 : i32
    %c0_i32_1 = arith.constant 0 : i32
    return %c0_i32, %c0_i32_0 : i32, i32
  }
  func.func @transform_8(%arg0: i32) -> (i32, i32) {
    %c0_i32 = arith.constant 0 : i32
    %c0_i32_0 = arith.constant 0 : i32
    %c0_i32_1 = arith.constant 0 : i32
    return %c0_i32, %c0_i32_0 : i32, i32
  }
  func.func @transform_9(%arg0: i32) -> (i32, i32) {
    %c0_i32 = arith.constant 0 : i32
    %c0_i32_0 = arith.constant 0 : i32
    %c0_i32_1 = arith.constant 0 : i32
    return %c0_i32, %c0_i32_0 : i32, i32
  }
  func.func @transform_10(%arg0: i32) -> (i32, i32) {
    %c0_i32 = arith.constant 0 : i32
    %c0_i32_0 = arith.constant 0 : i32
    %c0_i32_1 = arith.constant 0 : i32
    return %c0_i32, %c0_i32_0 : i32, i32
  }
  func.func @transform_11(%arg0: i32) -> (i32, i32) {
    %c0_i32 = arith.constant 0 : i32
    %c0_i32_0 = arith.constant 0 : i32
    %c0_i32_1 = arith.constant 0 : i32
    return %c0_i32, %c0_i32_0 : i32, i32
  }
  func.func @transform_12(%arg0: i32) -> (i32, i32) {
    %c0_i32 = arith.constant 0 : i32
    %c0_i32_0 = arith.constant 0 : i32
    %c0_i32_1 = arith.constant 0 : i32
    return %c0_i32, %c0_i32_0 : i32, i32
  }
  func.func @transform_13(%arg0: i32) -> (i32, i32) {
    %c0_i32 = arith.constant 0 : i32
    %c0_i32_0 = arith.constant 0 : i32
    %c0_i32_1 = arith.constant 0 : i32
    return %c0_i32, %c0_i32_0 : i32, i32
  }
  func.func @transform_14(%arg0: i32) -> (i32, i32) {
    %c0_i32 = arith.constant 0 : i32
    %c0_i32_0 = arith.constant 0 : i32
    %c0_i32_1 = arith.constant 0 : i32
    return %c0_i32, %c0_i32_0 : i32, i32
  }
  func.func @transform_15(%arg0: i32) -> (i32, i32) {
    %c0_i32 = arith.constant 0 : i32
    %c0_i32_0 = arith.constant 0 : i32
    %c0_i32_1 = arith.constant 0 : i32
    return %c0_i32, %c0_i32_0 : i32, i32
  }
  func.func @transform_16(%arg0: i32) -> (i32, i32) {
    %c0_i32 = arith.constant 0 : i32
    %c0_i32_0 = arith.constant 0 : i32
    %c0_i32_1 = arith.constant 0 : i32
    return %c0_i32, %c0_i32_0 : i32, i32
  }
  func.func @transform_17(%arg0: i32) -> (i32, i32) {
    %c0_i32 = arith.constant 0 : i32
    %c0_i32_0 = arith.constant 0 : i32
    return %arg0, %c0_i32 : i32, i32
  }
}

</mosaic_0001>

<bundles_post_ra>
// kernel: _lambda_.1
= control target key start
LH: loop header
LB: loop body
LE: loop exit
PB: predicated region body
PF: predicated region fallthrough
CT: control target
= control target key end

     0   :  { %s2510_s0 = inlined_call_operand.vmem [shape: f32[32,128], index: 0, kind: input, shape index: {}]   ;;  %s2511_s1 = inlined_call_operand.vmem [shape: bf16[128,128], index: 1, kind: input, shape index: {}]   ;;  %s2512_s2 = inlined_call_operand.vmem [shape: f32[1,128], index: 2, kind: input, shape index: {}]   ;;  %s2513_s3 = inlined_call_operand.vmem [shape: bf16[128,128], index: 3, kind: input, shape index: {}]   ;;  %s2514_s4 = inlined_call_operand.vmem [shape: f32[1,128], index: 4, kind: input, shape index: {}]   ;;  %s2515_s5 = inlined_call_operand.hbm [shape: bf16[128,128], index: 5, kind: input, shape index: {}]   ;;  %s2516_s6 = inlined_call_operand.vmem [shape: f32[1,128], index: 6, kind: input, shape index: {}]   ;;  %s2517_s7 = inlined_call_operand.hbm [shape: bf16[128,128], index: 7, kind: input, shape index: {}]   ;;  %s2518_s8 = inlined_call_operand.vmem [shape: f32[1,128], index: 8, kind: input, shape index: {}]   ;;  %s2519_s9 = inlined_call_operand.hbm [shape: bf16[128,128], index: 9, kind: input, shape index: {}]   ;;  %s2520_s10 = inlined_call_operand.vmem [shape: f32[1,128], index: 10, kind: input, shape index: {}]   ;;  %s2521_s11 = inlined_call_operand.hbm [shape: bf16[128,128], index: 11, kind: input, shape index: {}]   ;;  %s2522_s12 = inlined_call_operand.vmem [shape: f32[1,128], index: 12, kind: input, shape index: {}]   ;;  %s2523_s13 = inlined_call_operand.hbm [shape: bf16[128,128], index: 13, kind: input, shape index: {}]   ;;  %s2524_s14 = inlined_call_operand.vmem [shape: f32[1,128], index: 14, kind: input, shape index: {}]   ;;  %s2525_s15 = inlined_call_operand.hbm [shape: bf16[128,128], index: 15, kind: input, shape index: {}]   ;;  %s2526_s16 = inlined_call_operand.vmem [shape: f32[1,128], index: 16, kind: input, shape index: {}]   ;;  %s2527_s17 = inlined_call_operand.hbm [shape: f32[32,128], index: 17, kind: output, shape index: {}]  }
   0x1   :  { %2530 = sst [smem:[#allocation19_spill]] %s2510_s0 }
   0x2   :  { %2531 = sst [smem:[#allocation20_spill]] %s2511_s1 }
   0x3   :  { %22 = vsyncpa [#allocation3], 0 }
   0x4   :  { %23 = vsyncpa [#allocation6], 0 }
   0x5   :  { %24 = vsyncpa [#allocation9], 0 }
   0x6   :  { %25 = vsyncpa [#allocation12], 0 }
   0x7   :  { %26 = vsyncpa [#allocation4], 0  ;;  %s2001_s24 = smov [#allocation5]   ;;  %s2002_s26 = smov [#allocation8]  }
   0x8   :  { %s56_s25 = sshll.u32 %s2001_s24, 4  ;;  %s84_s27 = sshll.u32 %s2002_s26, 4  ;;  %s57_s25 = int_to_ptr.vmem [resolvable:$true] %s56_s25  ;;  %s2104_s27 = int_to_ptr.vmem [resolvable:$true] %s84_s27 }
   0x9   :  { %s1837_s0 = scalar_lea.hbm %s2517_s7, 1024 }
   0xa   :  { %p1838_p0 = scmp.ne.s32.totalorder %s2517_s7, %s1837_s0  ;;  %p1841_p1 = scmp.lt.u32.totalorder %s1837_s0, %s2517_s7 }
   0xc   :  { %p1843_p2 = pnand %p1841_p1, %p1838_p0 }
   0xe   :  { %1846 = shalt.err (!%p1843_p2)
}
   0xf   :  { %s1847_s20 = scalar_lea.vmem %s57_s25, 1024  ;;  %p1852_p4 = scmp.lt.s32.totalorder %s57_s25, %s57_s25 }
  0x10   :  { %p1848_p3 = scmp.ne.s32.totalorder %s57_s25, %s1847_s20  ;;  %p1853_p5 = scmp.lt.s32.totalorder %s1847_s20, %s1847_s20 }
  0x12   :  { %p1854_p6 = por %p1853_p5, %p1852_p4 }
  0x14   :  { %p1855_p7 = pnand %p1854_p6, %p1848_p3 }
  0x16   :  { %1858 = shalt.err (!%p1855_p7)
}
  0x17   :  { %s2003_s21 = smov 64   ;;  %s2004_s22 = smov 4  }
  0x18   :  { %62 = dma.hbm_to_vmem [thread:$0]  %s2517_s7, 1024, %s57_s25, [#allocation6], %s2003_s21, %s2003_s21, %s2004_s22  }
  0x19   :  { %s1859_s29 = scalar_lea.hbm %s2521_s11, 1024 }
  0x1a   :  { %p1860_p8 = scmp.ne.s32.totalorder %s2521_s11, %s1859_s29  ;;  %p1863_p9 = scmp.lt.u32.totalorder %s1859_s29, %s2521_s11 }
  0x1c   :  { %p1865_p10 = pnand %p1863_p9, %p1860_p8 }
  0x1e   :  { %1868 = shalt.err (!%p1865_p10)
}
  0x1f   :  { %s1869_s1 = scalar_lea.vmem %s2104_s27, 1024  ;;  %p1874_p12 = scmp.lt.s32.totalorder %s2104_s27, %s2104_s27 }
  0x20   :  { %p1870_p11 = scmp.ne.s32.totalorder %s2104_s27, %s1869_s1  ;;  %p1875_p13 = scmp.lt.s32.totalorder %s1869_s1, %s1869_s1 }
  0x22   :  { %p1876_p0 = por %p1875_p13, %p1874_p12 }
  0x24   :  { %p1877_p1 = pnand %p1876_p0, %p1870_p11 }
  0x26   :  { %1880 = shalt.err (!%p1877_p1)
}
  0x27   :  { %90 = dma.hbm_to_vmem [thread:$0]  %s2521_s11, 1024, %s2104_s27, [#allocation9], %s2003_s21, %s2003_s21, %s2004_s22  }
  0x28   :  { %s2005_s20 = smov [#allocation2]   ;;  %s2006_s24 = smov [#allocation7]  }
  0x29   :  { %s42_s23 = sshll.u32 %s2005_s20, 4  ;;  %s70_s26 = sshll.u32 %s2006_s24, 4  ;;  %s43_s23 = int_to_ptr.vmem [resolvable:$true] %s42_s23  ;;  %s2141_s26 = int_to_ptr.vmem [resolvable:$true] %s70_s26 }
  0x2a   :  { %s1881_s0 = scalar_lea.hbm %s2515_s5, 1024 }
  0x2b   :  { %p1882_p2 = scmp.ne.s32.totalorder %s2515_s5, %s1881_s0  ;;  %p1885_p3 = scmp.lt.u32.totalorder %s1881_s0, %s2515_s5 }
  0x2d   :  { %p1887_p4 = pnand %p1885_p3, %p1882_p2 }
  0x2f   :  { %1890 = shalt.err (!%p1887_p4)
}
  0x30   :  { %s1891_s11 = scalar_lea.vmem %s43_s23, 1024  ;;  %p1896_p6 = scmp.lt.s32.totalorder %s43_s23, %s43_s23 }
  0x31   :  { %p1892_p5 = scmp.ne.s32.totalorder %s43_s23, %s1891_s11  ;;  %p1897_p7 = scmp.lt.s32.totalorder %s1891_s11, %s1891_s11 }
  0x33   :  { %p1898_p8 = por %p1897_p7, %p1896_p6 }
  0x35   :  { %p1899_p9 = pnand %p1898_p8, %p1892_p5 }
  0x37   :  { %1902 = shalt.err (!%p1899_p9)
}
  0x38   :  { %48 = dma.hbm_to_vmem [thread:$0]  %s2515_s5, 1024, %s43_s23, [#allocation3], %s2003_s21, %s2003_s21, %s2004_s22  }
  0x39   :  { %s1903_s24 = scalar_lea.hbm %s2519_s9, 1024 }
  0x3a   :  { %p1904_p10 = scmp.ne.s32.totalorder %s2519_s9, %s1903_s24  ;;  %p1907_p11 = scmp.lt.u32.totalorder %s1903_s24, %s2519_s9 }
  0x3c   :  { %p1909_p12 = pnand %p1907_p11, %p1904_p10 }
  0x3e   :  { %1912 = shalt.err (!%p1909_p12)
}
  0x3f   :  { %s1913_s18 = scalar_lea.vmem %s2141_s26, 1024  ;;  %p1918_p0 = scmp.lt.s32.totalorder %s2141_s26, %s2141_s26 }
  0x40   :  { %p1914_p13 = scmp.ne.s32.totalorder %s2141_s26, %s1913_s18  ;;  %p1919_p1 = scmp.lt.s32.totalorder %s1913_s18, %s1913_s18 }
  0x42   :  { %p1920_p2 = por %p1919_p1, %p1918_p0 }
  0x44   :  { %p1921_p3 = pnand %p1920_p2, %p1914_p13 }
  0x46   :  { %1924 = shalt.err (!%p1921_p3)
}
  0x47   :  { %76 = dma.hbm_to_vmem [thread:$0]  %s2519_s9, 1024, %s2141_s26, [#allocation6], %s2003_s21, %s2003_s21, %s2004_s22  }
  0x48   :  { %s2007_s19 = smov [#allocation10]   ;;  %s2008_s11 = smov [#allocation11]  }
  0x49   :  { %s98_s1 = sshll.u32 %s2007_s19, 4  ;;  %s112_s27 = sshll.u32 %s2008_s11, 4  ;;  %s99_s1 = int_to_ptr.vmem [resolvable:$true] %s98_s1  ;;  %s2178_s27 = int_to_ptr.vmem [resolvable:$true] %s112_s27 }
  0x4a   :  { %s1925_s20 = scalar_lea.hbm %s2523_s13, 1024 }
  0x4b   :  { %p1926_p4 = scmp.ne.s32.totalorder %s2523_s13, %s1925_s20  ;;  %p1929_p5 = scmp.lt.u32.totalorder %s1925_s20, %s2523_s13 }
  0x4d   :  { %p1931_p6 = pnand %p1929_p5, %p1926_p4 }
  0x4f   :  { %1934 = shalt.err (!%p1931_p6)
}
  0x50   :  { %s1935_s9 = scalar_lea.vmem %s99_s1, 1024  ;;  %p1940_p8 = scmp.lt.s32.totalorder %s99_s1, %s99_s1 }
  0x51   :  { %p1936_p7 = scmp.ne.s32.totalorder %s99_s1, %s1935_s9  ;;  %p1941_p9 = scmp.lt.s32.totalorder %s1935_s9, %s1935_s9 }
  0x53   :  { %p1942_p10 = por %p1941_p9, %p1940_p8 }
  0x55   :  { %p1943_p11 = pnand %p1942_p10, %p1936_p7 }
  0x57   :  { %1946 = shalt.err (!%p1943_p11)
}
  0x58   :  { %104 = dma.hbm_to_vmem [thread:$0]  %s2523_s13, 1024, %s99_s1, [#allocation9], %s2003_s21, %s2003_s21, %s2004_s22  }
  0x59   :  { %s1947_s23 = scalar_lea.hbm %s2525_s15, 1024 }
  0x5a   :  { %p1948_p12 = scmp.ne.s32.totalorder %s2525_s15, %s1947_s23  ;;  %p1951_p13 = scmp.lt.u32.totalorder %s1947_s23, %s2525_s15 }
  0x5c   :  { %p1953_p0 = pnand %p1951_p13, %p1948_p12 }
  0x5e   :  { %1956 = shalt.err (!%p1953_p0)
}
  0x5f   :  { %s1957_s20 = scalar_lea.vmem %s2178_s27, 1024  ;;  %p1962_p2 = scmp.lt.s32.totalorder %s2178_s27, %s2178_s27 }
  0x60   :  { %p1958_p1 = scmp.ne.s32.totalorder %s2178_s27, %s1957_s20  ;;  %p1963_p3 = scmp.lt.s32.totalorder %s1957_s20, %s1957_s20 }
  0x62   :  { %p1964_p4 = por %p1963_p3, %p1962_p2 }
  0x64   :  { %p1965_p5 = pnand %p1964_p4, %p1958_p1 }
  0x66   :  { %1968 = shalt.err (!%p1965_p5)
}
  0x67   :  { %118 = dma.hbm_to_vmem [thread:$0]  %s2525_s15, 1024, %s2178_s27, [#allocation12], %s2003_s21, %s2003_s21, %s2004_s22  }
  0x68   :  { %1991 = dma.done.wait [#allocation3], 1024  }
  0x69   :  { %1992 = vsyncadd [#allocation3], 4294966272 }
  0x6a   :  { %1993 = dma.done.wait [#allocation6], 2048  }
  0x6b   :  { %1994 = vsyncadd [#allocation6], 4294965248 }
  0x6c   :  { %1995 = dma.done.wait [#allocation9], 2048  }
  0x6d   :  { %1996 = vsyncadd [#allocation9], 4294965248 }
  0x6e   :  { %1997 = dma.done.wait [#allocation12], 1024  }
  0x6f   :  { %1998 = vsyncadd [#allocation12], 4294966272  ;;  %v140_v0 = vlaneseq  ;;  %s2532_s21 = sld [smem:[#allocation19_spill]]  ;;  %s2009_s9 = smov 8   ;;  %v1781_v55 = vld [vmem:[#allocation2] sm:$0xff]   ;;  %v1783_v57 = vld [vmem:[#allocation2 + $0x8] sm:$0xff]  }
  0x70   :  { %s2533_s23 = sld [smem:[#allocation20_spill]]  ;;  %v1782_v56 = vld [vmem:[%s2513_s3] sm:$0xff]   ;;  %v1784_v58 = vld [vmem:[%s2513_s3 + $0x8] sm:$0xff]   ;;  %v1785_v59 = vld [vmem:[#allocation2 + $0x10] sm:$0xff]   ;;  %s2012_s19 = smov [#allocation13]  }
  0x71   :  { %v2215_v1 = vshrl.u32 %v140_v0, 7  ;;  %1620 = vmatprep.subr.bf16.mxu1 %v1782_v56  ;;  %v1786_v60 = vld [vmem:[%s2513_s3 + $0x10] sm:$0xff]   ;;  %v1787_v61 = vld [vmem:[#allocation2 + $0x18] sm:$0xff]   ;;  %v1789_v63 = vld [vmem:[#allocation2 + $0x20] sm:$0xff]   ;;  %s1433_s11 = sshll.u32 %s2012_s19, 4  ;;  %s1434_s11 = int_to_ptr.vmem [resolvable:$true] %s1433_s11 }
  0x72   :  { %1621 = vmatpush3.bf16.msra.mxu1 %v1782_v56  ;;  %v1788_v62 = vld [vmem:[%s2513_s3 + $0x18] sm:$0xff]   ;;  %v1790_v0 = vld [vmem:[%s2513_s3 + $0x20] sm:$0xff]   ;;  %s1969_s7 = scalar_lea.vmem %s1434_s11, 512  ;;  %p1974_p7 = scmp.lt.s32.totalorder %s1434_s11, %s1434_s11 }
  0x73   :  { %v143_v2 = vadd.s32 16, %v2215_v1  ;;  %v2219_v3 = vand.u32 15, %v2215_v1  ;;  %vm222_vm0 = vcmp.lt.s32.totalorder %v2215_v1, 1  ;;  %vm205_vm3 = vcmp.lt.s32.totalorder %v2215_v1, 2  ;;  %1622 = vmatprep.subr.bf16.mxu1 %v1784_v58  ;;  %p1970_p6 = scmp.ne.s32.totalorder %s1434_s11, %s1969_s7  ;;  %p1975_p8 = scmp.lt.s32.totalorder %s1969_s7, %s1969_s7 }
  0x74   :  { %vm693_vm6 = vcmp.lt.s32.totalorder %v2215_v1, 4 }
  0x75   :  { %v2221_v4 = vand.u32 15, %v143_v2  ;;  %v2226_v5 = vld [vmem:[%s2532_s21 + $0x8] sm:$0xff]  ;;  %v2231_v6 = vld [vmem:[%s2532_s21] sm:$0xff]  ;;  %v2236_v7 = vld [vmem:[%s2532_s21 + $0x10] sm:$0xff]  ;;  %vm214_vm1 = vcmp.ge.s32.totalorder %v2219_v3, 1  ;;  %vm197_vm4 = vcmp.ge.s32.totalorder %v2219_v3, 2  ;;  %p1976_p9 = por %p1975_p8, %p1974_p7 }
  0x76   :  { %245 = vrot.lane.b32.xlu1 %v2226_v5, %s2009_s9  ;;  %243 = vrot.lane.b32.xlu0 %v2231_v6, %s2009_s9  ;;  %v2247_v8 = vld [vmem:[%s2532_s21 + $0x18] sm:$0xff]  ;;  %v220_v9 = vrot.slane %v2236_v7, 7  ;;  %v218_v10 = vrot.slane %v2231_v6, 7  ;;  %v219_v11 = vrot.slane %v2226_v5, 7  ;;  %v1773_v12 = vld [vmem:[%s2533_s23] sm:$0xff]   ;;  %v202_v29 = vrot.slane %v2226_v5, 6 }
  0x77   :  { %vm216_vm2 = vcmp.ge.s32.totalorder %v2221_v4, 1  ;;  %v221_v13 = vrot.slane %v2247_v8, 7  ;;  %v1774_v14 = vld [vmem:[%s2533_s23 + $0x8] sm:$0xff]   ;;  %1600 = vmatprep.subr.bf16.mxu0 %v1773_v12  ;;  %v1775_v21 = vld [vmem:[%s2533_s23 + $0x10] sm:$0xff]   ;;  %v1776_v22 = vld [vmem:[%s2533_s23 + $0x18] sm:$0xff]   ;;  %v201_v30 = vrot.slane %v2231_v6, 6  ;;  %1623 = vmatpush3.bf16.msra.mxu1 %v1784_v58  ;;  %p1977_p10 = pnand %p1976_p9, %p1970_p6 }
  0x78   :  { %v225_v15 = vsel %vm222_vm0, %v218_v10, %v219_v11  ;;  %v224_v16 = vsel %vm222_vm0, %v219_v11, %v220_v9  ;;  %1601 = vmatpush3.bf16.msra.mxu0 %v1773_v12  ;;  %v1777_v23 = vld [vmem:[%s2533_s23 + $0x20] sm:$0xff]   ;;  %v1778_v24 = vld [vmem:[%s2533_s23 + $0x28] sm:$0xff]   ;;  %v1779_v25 = vld [vmem:[%s2533_s23 + $0x30] sm:$0xff]   ;;  %v204_v31 = vrot.slane %v2247_v8, 6  ;;  %v203_v32 = vrot.slane %v2236_v7, 6  ;;  %1624 = vmatprep.subr.bf16.mxu1 %v1786_v60 }
  0x79   :  { %v223_v17 = vsel %vm222_vm0, %v220_v9, %v221_v13  ;;  %v226_v18 = vsel %vm222_vm0, %v221_v13, %v218_v10  ;;  %v229_v19 = vsel %vm216_vm2, %v224_v16, 0.0  ;;  %1602 = vmatprep.subr.bf16.mxu0 %v1774_v14  ;;  %v1780_v26 = vld [vmem:[%s2533_s23 + $0x38] sm:$0xff]   ;;  %v208_v36 = vsel %vm205_vm3, %v201_v30, %v202_v29  ;;  %v1791_v2 = vld [vmem:[#allocation2 + $0x28] sm:$0xff]   ;;  %v1448_v10 = vld [vmem:[%s2512_s2] ss:$0 sm:$0xff]  ;;  %s2010_s2 = smov 16  }
  0x7a   :  { %237 = vrot.lane.b32.xlu1 %v223_v17, %s2004_s22  ;;  %233 = vrot.lane.b32.xlu0 %v225_v15, %s2004_s22  ;;  %v227_v20 = vsel %vm214_vm1, %v226_v18, 0.0  ;;  %v209_v33 = vsel %vm205_vm3, %v204_v31, %v201_v30  ;;  %vm199_vm5 = vcmp.ge.s32.totalorder %v2221_v4, 2  ;;  %v207_v37 = vsel %vm205_vm3, %v202_v29, %v203_v32  ;;  %v1792_v9 = vld [vmem:[%s2513_s3 + $0x28] sm:$0xff]   ;;  %v1794_v17 = vld [vmem:[%s2513_s3 + $0x30] sm:$0xff]  }
  0x7b   :  { %v210_v38 = vsel %vm197_vm4, %v209_v33, 0.0  ;;  %v206_v40 = vsel %vm205_vm3, %v203_v32, %v204_v31  ;;  %v212_v42 = vsel %vm199_vm5, %v207_v37, 0.0  ;;  %1625 = vmatpush3.bf16.msra.mxu1 %v1786_v60  ;;  %vm685_vm7 = vcmp.ge.s32.totalorder %v2219_v3, 4  ;;  %v1822_v3 = vld [vmem:[#allocation10 + $0x8] sm:$0xff]  }
  0x7c   :  { %1603 = vmatpush3.bf16.msra.mxu0 %v1774_v14  ;;  %1626 = vmatprep.subr.bf16.mxu1 %v1788_v62  ;;  %v1793_v14 = vld [vmem:[#allocation2 + $0x30] sm:$0xff]   ;;  %vm687_vm8 = vcmp.ge.s32.totalorder %v2221_v4, 4  ;;  %v1824_v4 = vld [vmem:[#allocation10 + $0x18] sm:$0xff]  }
  0x7d   :  { %1604 = vmatprep.subr.bf16.mxu0 %v1775_v21 }
  0x7e   :  { %235 = vrot.lane.b32.xlu1 %v229_v19, %s2004_s22  ;;  %231 = vrot.lane.b32.xlu0 %v227_v20, %s2004_s22 }
  0x7f   :  { %1627 = vmatpush3.bf16.msra.mxu1 %v1788_v62 }
  0x80   :  { %1605 = vmatpush3.bf16.msra.mxu0 %v1775_v21  ;;  %1628 = vmatprep.subr.bf16.mxu1 %v1790_v0 }
  0x81   :  { %1606 = vmatprep.subr.bf16.mxu0 %v1776_v22 }
  0x82   :  { %249 = vrot.lane.b32.xlu1 %v2247_v8, %s2009_s9  ;;  %247 = vrot.lane.b32.xlu0 %v2236_v7, %s2009_s9 }
  0x83   :  { %1629 = vmatpush3.bf16.msra.mxu1 %v1790_v0 }
  0x84   :  { %1607 = vmatpush3.bf16.msra.mxu0 %v1776_v22  ;;  %1630 = vmatprep.subr.bf16.mxu1 %v1792_v9 }
  0x85   :  { %1608 = vmatprep.subr.bf16.mxu0 %v1777_v23 }
  0x87   :  { %1631 = vmatpush3.bf16.msra.mxu1 %v1792_v9 }
  0x88   :  { %1609 = vmatpush3.bf16.msra.mxu0 %v1777_v23  ;;  %1632 = vmatprep.subr.bf16.mxu1 %v1794_v17 }
  0x89   :  { %1610 = vmatprep.subr.bf16.mxu0 %v1778_v24 }
  0x8b   :  { %1633 = vmatpush3.bf16.msra.mxu1 %v1794_v17 }
  0x8c   :  { %1611 = vmatpush3.bf16.msra.mxu0 %v1778_v24  ;;  %v1795_v24 = vld [vmem:[#allocation2 + $0x38] sm:$0xff]  }
  0x8d   :  { %1612 = vmatprep.subr.bf16.mxu0 %v1779_v25 }
  0x90   :  { %1613 = vmatpush3.bf16.msra.mxu0 %v1779_v25 }
  0x91   :  { %1614 = vmatprep.subr.bf16.mxu0 %v1780_v26 }
  0x94   :  { %1615 = vmatpush3.bf16.msra.mxu0 %v1780_v26 }
  0x95   :  { %1640 = vmatprep.subr.bf16.mxu0 %v1781_v55 }
  0xe8   :  { %v246_v27 = vpop.permute.xlu1 %245  ;;  %v244_v28 = vpop.permute.xlu0 %243 }
  0xec   :  { %v238_v34 = vpop.permute.xlu1 %237  ;;  %v234_v35 = vpop.permute.xlu0 %233 }
  0xed   :  { %v240_v39 = vadd.f32 %v234_v35, %v208_v36  ;;  %v242_v45 = vadd.f32 %v238_v34, %v206_v40  ;;  %v555_v35 = vpack.c.bf16 %v2226_v5, %v2231_v6 }
  0xef   :  { %v252_v48 = vadd.f32 %v246_v27, %v240_v39 }
  0xf0   :  { %v236_v41 = vpop.permute.xlu1 %235  ;;  %v232_v43 = vpop.permute.xlu0 %231 }
  0xf1   :  { %v239_v44 = vadd.f32 %v232_v43, %v210_v38  ;;  %v241_v46 = vadd.f32 %v236_v41, %v212_v42  ;;  %v556_v43 = vpack.c.bf16 %v2247_v8, %v2236_v7 }
  0xf3   :  { %v251_v47 = vadd.f32 %v244_v28, %v239_v44  ;;  %v1796_v28 = vld [vmem:[%s2513_s3 + $0x38] sm:$0xff]  }
  0xf4   :  { %v250_v49 = vpop.permute.xlu1 %249  ;;  %v248_v50 = vpop.permute.xlu0 %247  ;;  %1634 = vmatprep.subr.bf16.mxu1 %v1796_v28 }
  0xf5   :  { %v254_v51 = vadd.f32 %v250_v49, %v242_v45  ;;  %v253_v52 = vadd.f32 %v248_v50, %v241_v46  ;;  %v255_v53 = vpack.c.bf16 %v252_v48, %v251_v47  ;;  %1635 = vmatpush3.bf16.msra.mxu1 %v1796_v28 }
  0xf7   :  { %v256_v54 = vpack.c.bf16 %v254_v51, %v253_v52  ;;  %1616 = vmatprep.mubr.bf16.mxu0 %v255_v53 }
  0xf9   :  { %1617 = vmatmul.mubr.bf16.vlgmr.msra.gmra.mrb[0].mxu0 %v256_v54 }
  0xfa   :  { %1641 = vmatpush3.bf16.msra.mxu0 %v1781_v55  ;;  %1656 = vmatprep.mubr.bf16.mxu0 %v555_v35 }
  0xfb   :  { %1642 = vmatprep.subr.bf16.mxu0 %v1783_v57 }
  0xfe   :  { %1643 = vmatpush3.bf16.msra.mxu0 %v1783_v57 }
  0xff   :  { %1644 = vmatprep.subr.bf16.mxu0 %v1785_v59 }
 0x102   :  { %1645 = vmatpush3.bf16.msra.mxu0 %v1785_v59 }
 0x103   :  { %1646 = vmatprep.subr.bf16.mxu0 %v1787_v61 }
 0x106   :  { %1647 = vmatpush3.bf16.msra.mxu0 %v1787_v61 }
 0x107   :  { %1648 = vmatprep.subr.bf16.mxu0 %v1789_v63 }
 0x10a   :  { %1649 = vmatpush3.bf16.msra.mxu0 %v1789_v63 }
 0x10b   :  { %1650 = vmatprep.subr.bf16.mxu0 %v1791_v2 }
 0x10e   :  { %1651 = vmatpush3.bf16.msra.mxu0 %v1791_v2 }
 0x10f   :  { %1652 = vmatprep.subr.bf16.mxu0 %v1793_v14 }
 0x112   :  { %1653 = vmatpush3.bf16.msra.mxu0 %v1793_v14  ;;  %v1801_v14 = vld [vmem:[#allocation5 + $0x20] sm:$0xff]  }
 0x113   :  { %1654 = vmatprep.subr.bf16.mxu0 %v1795_v24 }
 0x116   :  { %1655 = vmatpush3.bf16.msra.mxu0 %v1795_v24 }
 0x119   :  { %1657 = vmatmul.mubr.bf16.vlgmr.msra.gmra.mrb[4].mxu0 %v556_v43 }
 0x1cc   :  { %v1618_v11 = vpop.f32.mrb[0].mxu0 }
 0x1cd   :  { %v371_v12 = vadd.f32 %v1618_v11, %v1448_v10  ;;  %v362_v13 = vpop.f32.mrb[1].mxu0  ;;  %v1798_v11 = vld [vmem:[#allocation5 + $0x8] sm:$0xff]  }
 0x1ce   :  { %v363_v15 = vadd.f32 %v1448_v10, %v362_v13  ;;  %v1619_v16 = vpop.f32.mrb[2].mxu0  ;;  %v1800_v13 = vld [vmem:[#allocation5 + $0x18] sm:$0xff]  }
 0x1cf   :  { %v379_v18 = vmax.f32 %v371_v12, 0.0  ;;  %v374_v19 = vadd.f32 %v1619_v16, %v1448_v10  ;;  %v365_v20 = vpop.f32.mrb[3].mxu0  ;;  %v1799_v12 = vld [vmem:[#allocation5 + $0x10] sm:$0xff]   ;;  %v1457_v16 = vld [vmem:[%s2514_s4] ss:$0 sm:$0xff] }
 0x1d0   :  { %v377_v21 = vmax.f32 %v363_v15, 0.0  ;;  %v366_v22 = vadd.f32 %v1448_v10, %v365_v20  ;;  %v1797_v10 = vld [vmem:[#allocation5] sm:$0xff]  }
 0x1d1   :  { %v380_v23 = vmax.f32 %v374_v19, 0.0  ;;  %v383_v29 = vrot.slane %v379_v18, 6  ;;  %v395_v30 = vrot.slane %v379_v18, 7  ;;  %1660 = vmatprep.subr.bf16.mxu1 %v1797_v10  ;;  %v1466_v15 = vld [vmem:[%s2516_s6] ss:$0 sm:$0xff] }
 0x1d2   :  { %v381_v25 = vrot.slane %v377_v21, 6  ;;  %v393_v26 = vrot.slane %v377_v21, 7  ;;  %v378_v27 = vmax.f32 %v366_v22, 0.0  ;;  %417 = vrot.lane.b32.xlu0 %v377_v21, %s2010_s2  ;;  %v1802_v21 = vld [vmem:[#allocation5 + $0x28] sm:$0xff]  }
 0x1d3   :  { %v384_v31 = vrot.slane %v380_v23, 6  ;;  %v396_v32 = vrot.slane %v380_v23, 7 }
 0x1d4   :  { %v382_v33 = vrot.slane %v378_v27, 6  ;;  %v394_v34 = vrot.slane %v378_v27, 7  ;;  %419 = vrot.lane.b32.xlu1 %v378_v27, %s2010_s2 }
 0x1d5   :  { %v400_v36 = vsel %vm222_vm0, %v396_v32, %v393_v26  ;;  %v397_v37 = vsel %vm222_vm0, %v395_v30, %v396_v32  ;;  %v388_v38 = vsel %vm205_vm3, %v384_v31, %v381_v25  ;;  %v385_v39 = vsel %vm205_vm3, %v383_v29, %v384_v31 }
 0x1d6   :  { %v401_v40 = vsel %vm214_vm1, %v400_v36, 0.0  ;;  %v398_v41 = vsel %vm222_vm0, %v394_v34, %v395_v30  ;;  %v399_v5 = vsel %vm222_vm0, %v393_v26, %v394_v34  ;;  %v386_v6 = vsel %vm205_vm3, %v382_v33, %v383_v29 }
 0x1d7   :  { %405 = vrot.lane.b32.xlu0 %v401_v40, %s2009_s9  ;;  %v387_v42 = vsel %vm205_vm3, %v381_v25, %v382_v33  ;;  %v403_v44 = vsel %vm216_vm2, %v398_v41, 0.0  ;;  %v389_v7 = vsel %vm197_vm4, %v388_v38, 0.0  ;;  %v391_v51 = vsel %vm199_vm5, %v386_v6, 0.0  ;;  %v1803_v33 = vld [vmem:[#allocation5 + $0x30] sm:$0xff]  }
 0x1d8   :  { %411 = vrot.lane.b32.xlu1 %v397_v37, %s2009_s9 }
 0x1db   :  { %409 = vrot.lane.b32.xlu0 %v403_v44, %s2009_s9 }
 0x1dc   :  { %407 = vrot.lane.b32.xlu1 %v399_v5, %s2009_s9  ;;  %v1804_v5 = vld [vmem:[#allocation5 + $0x38] sm:$0xff]  }
 0x1df   :  { %421 = vrot.lane.b32.xlu0 %v379_v18, %s2010_s2 }
 0x1e0   :  { %423 = vrot.lane.b32.xlu1 %v380_v23, %s2010_s2 }
 0x1ec   :  { %v1658_v63 = vpop.f32.mrb[4].mxu0 }
 0x1ed   :  { %v662_v0 = vpop.f32.mrb[5].mxu0  ;;  %v671_v18 = vadd.f32 %v1658_v63, %v1466_v15 }
 0x1ee   :  { %v1659_v2 = vpop.f32.mrb[6].mxu0  ;;  %v663_v22 = vadd.f32 %v1466_v15, %v662_v0 }
 0x1ef   :  { %v665_v9 = vpop.f32.mrb[7].mxu0  ;;  %v674_v31 = vadd.f32 %v1659_v2, %v1466_v15 }
 0x1f0   :  { %v666_v35 = vadd.f32 %v1466_v15, %v665_v9 }
 0x244   :  { %v418_v45 = vpop.permute.xlu0 %417 }
 0x246   :  { %v420_v46 = vpop.permute.xlu1 %419 }
 0x249   :  { %v406_v47 = vpop.permute.xlu0 %405 }
 0x24a   :  { %v412_v48 = vpop.permute.xlu1 %411  ;;  %v413_v8 = vadd.f32 %v406_v47, %v389_v7 }
 0x24b   :  { %v416_v54 = vadd.f32 %v412_v48, %v385_v39 }
 0x24c   :  { %v425_v56 = vadd.f32 %v418_v45, %v413_v8 }
 0x24d   :  { %v410_v49 = vpop.permute.xlu0 %409 }
 0x24e   :  { %v408_v50 = vpop.permute.xlu1 %407  ;;  %v415_v53 = vadd.f32 %v410_v49, %v391_v51 }
 0x24f   :  { %v414_v52 = vadd.f32 %v408_v50, %v387_v42 }
 0x251   :  { %v422_v55 = vpop.permute.xlu0 %421  ;;  %v426_v57 = vadd.f32 %v420_v46, %v414_v52 }
 0x252   :  { %v427_v58 = vadd.f32 %v422_v55, %v415_v53  ;;  %v424_v59 = vpop.permute.xlu1 %423 }
 0x253   :  { %v428_v60 = vadd.f32 %v424_v59, %v416_v54  ;;  %v429_v61 = vpack.c.bf16 %v426_v57, %v425_v56  ;;  %v1805_v54 = vld [vmem:[#allocation8] sm:$0xff]  }
 0x255   :  { %v430_v62 = vpack.c.bf16 %v428_v60, %v427_v58  ;;  %1636 = vmatprep.mubr.bf16.mxu1 %v429_v61 }
 0x257   :  { %1637 = vmatmul.mubr.bf16.vlgmr.msra.gmra.mrb[0].mxu1 %v430_v62 }
 0x258   :  { %1661 = vmatpush3.bf16.msra.mxu1 %v1797_v10 }
 0x259   :  { %1662 = vmatprep.subr.bf16.mxu1 %v1798_v11 }
 0x25c   :  { %1663 = vmatpush3.bf16.msra.mxu1 %v1798_v11 }
 0x25d   :  { %1664 = vmatprep.subr.bf16.mxu1 %v1799_v12 }
 0x260   :  { %1665 = vmatpush3.bf16.msra.mxu1 %v1799_v12 }
 0x261   :  { %1666 = vmatprep.subr.bf16.mxu1 %v1800_v13 }
 0x264   :  { %1667 = vmatpush3.bf16.msra.mxu1 %v1800_v13 }
 0x265   :  { %1668 = vmatprep.subr.bf16.mxu1 %v1801_v14 }
 0x268   :  { %1669 = vmatpush3.bf16.msra.mxu1 %v1801_v14 }
 0x269   :  { %1670 = vmatprep.subr.bf16.mxu1 %v1802_v21 }
 0x26c   :  { %1671 = vmatpush3.bf16.msra.mxu1 %v1802_v21 }
 0x26d   :  { %1672 = vmatprep.subr.bf16.mxu1 %v1803_v33 }
 0x270   :  { %1673 = vmatpush3.bf16.msra.mxu1 %v1803_v33  ;;  %v1815_v33 = vld [vmem:[#allocation7 + $0x10] sm:$0xff]  }
 0x271   :  { %1674 = vmatprep.subr.bf16.mxu1 %v1804_v5 }
 0x274   :  { %1675 = vmatpush3.bf16.msra.mxu1 %v1804_v5 }
 0x275   :  { %1700 = vmatprep.subr.bf16.mxu1 %v1805_v54 }
 0x32a   :  { %v1638_v17 = vpop.f32.mrb[0].mxu1 }
 0x32b   :  { %v545_v19 = vadd.f32 %v1638_v17, %v1457_v16  ;;  %v536_v20 = vpop.f32.mrb[1].mxu1 }
 0x32c   :  { %v537_v23 = vadd.f32 %v1457_v16, %v536_v20  ;;  %v1639_v24 = vpop.f32.mrb[2].mxu1 }
 0x32d   :  { %v553_v25 = vmax.f32 %v545_v19, 0.0  ;;  %v548_v26 = vadd.f32 %v1639_v24, %v1457_v16  ;;  %v539_v27 = vpop.f32.mrb[3].mxu1  ;;  %v1806_v24 = vld [vmem:[#allocation8 + $0x8] sm:$0xff]  }
 0x32e   :  { %v551_v28 = vmax.f32 %v537_v23, 0.0  ;;  %v540_v29 = vadd.f32 %v1457_v16, %v539_v27  ;;  %v1809_v27 = vld [vmem:[#allocation8 + $0x20] sm:$0xff]  }
 0x32f   :  { %v679_v30 = vadd.f32 %v671_v18, %v553_v25  ;;  %v554_v32 = vmax.f32 %v548_v26, 0.0  ;;  %v1807_v25 = vld [vmem:[#allocation8 + $0x10] sm:$0xff]   ;;  %v1808_v26 = vld [vmem:[#allocation8 + $0x18] sm:$0xff]  }
 0x330   :  { %v677_v34 = vadd.f32 %v663_v22, %v551_v28  ;;  %v552_v36 = vmax.f32 %v540_v29, 0.0  ;;  %v1810_v28 = vld [vmem:[#allocation8 + $0x28] sm:$0xff]   ;;  %v1811_v29 = vld [vmem:[#allocation8 + $0x30] sm:$0xff]  }
 0x331   :  { %v2386_v37 = vmax.f32 %v679_v30, 0.0  ;;  %v680_v38 = vadd.f32 %v674_v31, %v554_v32  ;;  %v1812_v30 = vld [vmem:[#allocation8 + $0x38] sm:$0xff]   ;;  %v1813_v31 = vld [vmem:[#allocation7] sm:$0xff]   ;;  %v1814_v32 = vld [vmem:[#allocation7 + $0x8] sm:$0xff]  }
 0x332   :  { %v2388_v39 = vmax.f32 %v677_v34, 0.0  ;;  %v678_v40 = vadd.f32 %v666_v35, %v552_v36  ;;  %1680 = vmatprep.subr.bf16.mxu0 %v1813_v31  ;;  %v1816_v34 = vld [vmem:[#allocation7 + $0x18] sm:$0xff]   ;;  %v1817_v35 = vld [vmem:[#allocation7 + $0x20] sm:$0xff]  }
 0x333   :  { %v2390_v41 = vmax.f32 %v680_v38, 0.0  ;;  %v704_v43 = vrot.slane %v2386_v37, 6  ;;  %v691_v47 = vrot.slane %v2386_v37, 4  ;;  %1681 = vmatpush3.bf16.msra.mxu0 %v1813_v31  ;;  %v1475_v36 = vld [vmem:[%s2518_s8] ss:$0 sm:$0xff]  ;;  %s2011_s8 = smov 32  }
 0x334   :  { %v682_v6 = vmax.f32 %v678_v40, 0.0  ;;  %726 = vrot.lane.b32.xlu0 %v2388_v39, %s2010_s2  ;;  %v702_v42 = vrot.slane %v2388_v39, 6  ;;  %v689_v44 = vrot.slane %v2388_v39, 4  ;;  %1682 = vmatprep.subr.bf16.mxu0 %v1814_v32 }
 0x335   :  { %v705_v45 = vrot.slane %v2390_v41, 6  ;;  %v692_v46 = vrot.slane %v2390_v41, 4  ;;  %v1039_v48 = vpack.c.bf16 %v2390_v41, %v2386_v37 }
 0x336   :  { %728 = vrot.lane.b32.xlu1 %v682_v6, %s2010_s2  ;;  %v703_v7 = vrot.slane %v682_v6, 6  ;;  %v690_v8 = vrot.slane %v682_v6, 4  ;;  %v1038_v49 = vpack.c.bf16 %v682_v6, %v2388_v39  ;;  %v1819_v6 = vld [vmem:[#allocation7 + $0x30] sm:$0xff]  }
 0x337   :  { %v709_v50 = vsel %vm205_vm3, %v705_v45, %v702_v42  ;;  %v706_v51 = vsel %vm205_vm3, %v704_v43, %v705_v45  ;;  %v697_v52 = vsel %vm693_vm6, %v692_v46, %v689_v44  ;;  %v694_v53 = vsel %vm693_vm6, %v691_v47, %v692_v46  ;;  %1683 = vmatpush3.bf16.msra.mxu0 %v1814_v32 }
 0x338   :  { %v710_v55 = vsel %vm197_vm4, %v709_v50, 0.0  ;;  %v707_v56 = vsel %vm205_vm3, %v703_v7, %v704_v43  ;;  %v708_v57 = vsel %vm205_vm3, %v702_v42, %v703_v7  ;;  %v695_v58 = vsel %vm693_vm6, %v690_v8, %v691_v47  ;;  %1684 = vmatprep.subr.bf16.mxu0 %v1815_v33 }
 0x339   :  { %714 = vrot.lane.b32.xlu0 %v710_v55, %s2009_s9  ;;  %v696_v59 = vsel %vm693_vm6, %v689_v44, %v690_v8  ;;  %v712_v60 = vsel %vm199_vm5, %v707_v56, 0.0  ;;  %v698_v2 = vsel %vm685_vm7, %v697_v52, 0.0  ;;  %v700_v12 = vsel %vm687_vm8, %v695_v58, 0.0 }
 0x33a   :  { %720 = vrot.lane.b32.xlu1 %v706_v51, %s2009_s9 }
 0x33b   :  { %1685 = vmatpush3.bf16.msra.mxu0 %v1815_v33  ;;  %v1823_v33 = vld [vmem:[#allocation10 + $0x10] sm:$0xff]  }
 0x33c   :  { %1686 = vmatprep.subr.bf16.mxu0 %v1816_v34 }
 0x33d   :  { %718 = vrot.lane.b32.xlu0 %v712_v60, %s2009_s9 }
 0x33e   :  { %716 = vrot.lane.b32.xlu1 %v708_v57, %s2009_s9 }
 0x33f   :  { %1687 = vmatpush3.bf16.msra.mxu0 %v1816_v34  ;;  %v1825_v34 = vld [vmem:[#allocation10 + $0x20] sm:$0xff]  }
 0x340   :  { %1688 = vmatprep.subr.bf16.mxu0 %v1817_v35 }
 0x341   :  { %730 = vrot.lane.b32.xlu0 %v2386_v37, %s2010_s2  ;;  %v1818_v37 = vld [vmem:[#allocation7 + $0x28] sm:$0xff]  }
 0x342   :  { %732 = vrot.lane.b32.xlu1 %v2390_v41, %s2010_s2 }
 0x343   :  { %1689 = vmatpush3.bf16.msra.mxu0 %v1817_v35  ;;  %v1826_v35 = vld [vmem:[#allocation10 + $0x28] sm:$0xff]  }
 0x344   :  { %1690 = vmatprep.subr.bf16.mxu0 %v1818_v37 }
 0x347   :  { %1691 = vmatpush3.bf16.msra.mxu0 %v1818_v37  ;;  %v1828_v37 = vld [vmem:[#allocation10 + $0x38] sm:$0xff]  }
 0x348   :  { %1692 = vmatprep.subr.bf16.mxu0 %v1819_v6 }
 0x34b   :  { %1693 = vmatpush3.bf16.msra.mxu0 %v1819_v6  ;;  %v1484_v6 = vld [vmem:[%s2520_s10] ss:$0 sm:$0xff] }
 0x3a6   :  { %v727_v61 = vpop.permute.xlu0 %726 }
 0x3a8   :  { %v729_v62 = vpop.permute.xlu1 %728 }
 0x3ab   :  { %v715_v63 = vpop.permute.xlu0 %714 }
 0x3ac   :  { %v721_v0 = vpop.permute.xlu1 %720  ;;  %v722_v9 = vadd.f32 %v715_v63, %v698_v2  ;;  %v1821_v2 = vld [vmem:[#allocation10] sm:$0xff]  }
 0x3ad   :  { %v725_v16 = vadd.f32 %v721_v0, %v694_v53 }
 0x3ae   :  { %v734_v15 = vadd.f32 %v727_v61, %v722_v9 }
 0x3af   :  { %v719_v10 = vpop.permute.xlu0 %718 }
 0x3b0   :  { %v717_v11 = vpop.permute.xlu1 %716  ;;  %v724_v14 = vadd.f32 %v719_v10, %v700_v12 }
 0x3b1   :  { %v723_v13 = vadd.f32 %v717_v11, %v696_v59 }
 0x3b3   :  { %v735_v17 = vadd.f32 %v729_v62, %v723_v13  ;;  %v731_v18 = vpop.permute.xlu0 %730 }
 0x3b4   :  { %v736_v19 = vadd.f32 %v731_v18, %v724_v14  ;;  %v733_v20 = vpop.permute.xlu1 %732 }
 0x3b5   :  { %v737_v21 = vadd.f32 %v733_v20, %v725_v16  ;;  %v738_v22 = vpack.c.bf16 %v735_v17, %v734_v15 }
 0x3b7   :  { %v739_v23 = vpack.c.bf16 %v737_v21, %v736_v19  ;;  %1676 = vmatprep.mubr.bf16.mxu1 %v738_v22 }
 0x3b9   :  { %1677 = vmatmul.mubr.bf16.vlgmr.msra.gmra.mrb[4].mxu1 %v739_v23 }
 0x3ba   :  { %1701 = vmatpush3.bf16.msra.mxu1 %v1805_v54  ;;  %1716 = vmatprep.mubr.bf16.mxu1 %v1038_v49  ;;  %v1820_v49 = vld [vmem:[#allocation7 + $0x38] sm:$0xff]  }
 0x3bb   :  { %1702 = vmatprep.subr.bf16.mxu1 %v1806_v24  ;;  %1694 = vmatprep.subr.bf16.mxu0 %v1820_v49 }
 0x3bc   :  { %1695 = vmatpush3.bf16.msra.mxu0 %v1820_v49 }
 0x3bd   :  { %1720 = vmatprep.subr.bf16.mxu0 %v1821_v2 }
 0x3be   :  { %1703 = vmatpush3.bf16.msra.mxu1 %v1806_v24 }
 0x3bf   :  { %1704 = vmatprep.subr.bf16.mxu1 %v1807_v25 }
 0x3c2   :  { %1705 = vmatpush3.bf16.msra.mxu1 %v1807_v25 }
 0x3c3   :  { %1706 = vmatprep.subr.bf16.mxu1 %v1808_v26 }
 0x3c6   :  { %1707 = vmatpush3.bf16.msra.mxu1 %v1808_v26 }
 0x3c7   :  { %1708 = vmatprep.subr.bf16.mxu1 %v1809_v27 }
 0x3ca   :  { %1709 = vmatpush3.bf16.msra.mxu1 %v1809_v27 }
 0x3cb   :  { %1710 = vmatprep.subr.bf16.mxu1 %v1810_v28 }
 0x3ce   :  { %1711 = vmatpush3.bf16.msra.mxu1 %v1810_v28 }
 0x3cf   :  { %1712 = vmatprep.subr.bf16.mxu1 %v1811_v29 }
 0x3d2   :  { %1713 = vmatpush3.bf16.msra.mxu1 %v1811_v29 }
 0x3d3   :  { %1714 = vmatprep.subr.bf16.mxu1 %v1812_v30 }
 0x3d6   :  { %1715 = vmatpush3.bf16.msra.mxu1 %v1812_v30 }
 0x3d9   :  { %1717 = vmatmul.mubr.bf16.vlgmr.msra.gmra.mrb[8].mxu1 %v1039_v48 }
 0x48c   :  { %v1678_v38 = vpop.f32.mrb[4].mxu1 }
 0x48d   :  { %v854_v39 = vadd.f32 %v1678_v38, %v1475_v36  ;;  %v845_v40 = vpop.f32.mrb[5].mxu1  ;;  %v1829_v38 = vld [vmem:[#allocation11] sm:$0xff]  }
 0x48e   :  { %v846_v41 = vadd.f32 %v1475_v36, %v845_v40  ;;  %v1679_v5 = vpop.f32.mrb[6].mxu1  ;;  %1740 = vmatprep.subr.bf16.mxu1 %v1829_v38  ;;  %v1831_v40 = vld [vmem:[#allocation11 + $0x10] sm:$0xff]  }
 0x48f   :  { %v862_v42 = vmax.f32 %v854_v39, 0.0  ;;  %v857_v43 = vadd.f32 %v1679_v5, %v1475_v36  ;;  %v848_v44 = vpop.f32.mrb[7].mxu1  ;;  %v1830_v39 = vld [vmem:[#allocation11 + $0x8] sm:$0xff]   ;;  %1741 = vmatpush3.bf16.msra.mxu1 %v1829_v38  ;;  %v1833_v5 = vld [vmem:[#allocation11 + $0x20] sm:$0xff]  }
 0x490   :  { %v860_v45 = vmax.f32 %v846_v41, 0.0  ;;  %v849_v46 = vadd.f32 %v1475_v36, %v848_v44  ;;  %v1827_v36 = vld [vmem:[#allocation10 + $0x30] sm:$0xff]   ;;  %1742 = vmatprep.subr.bf16.mxu1 %v1830_v39  ;;  %v1832_v41 = vld [vmem:[#allocation11 + $0x18] sm:$0xff]  }
 0x491   :  { %v863_v47 = vmax.f32 %v857_v43, 0.0  ;;  %v866_v50 = vrot.slane %v862_v42, 4  ;;  %v878_v51 = vrot.slane %v862_v42, 6 }
 0x492   :  { %v864_v48 = vrot.slane %v860_v45, 4  ;;  %v876_v7 = vrot.slane %v860_v45, 6  ;;  %v861_v8 = vmax.f32 %v849_v46, 0.0  ;;  %900 = vrot.lane.b32.xlu0 %v860_v45, %s2011_s8 }
 0x493   :  { %v867_v52 = vrot.slane %v863_v47, 4  ;;  %v879_v53 = vrot.slane %v863_v47, 6  ;;  %1743 = vmatpush3.bf16.msra.mxu1 %v1830_v39 }
 0x494   :  { %v865_v54 = vrot.slane %v861_v8, 4  ;;  %v877_v55 = vrot.slane %v861_v8, 6  ;;  %902 = vrot.lane.b32.xlu1 %v861_v8, %s2011_s8  ;;  %1744 = vmatprep.subr.bf16.mxu1 %v1831_v40 }
 0x495   :  { %v883_v56 = vsel %vm205_vm3, %v879_v53, %v876_v7  ;;  %v880_v57 = vsel %vm205_vm3, %v878_v51, %v879_v53  ;;  %v871_v58 = vsel %vm693_vm6, %v867_v52, %v864_v48  ;;  %v868_v59 = vsel %vm693_vm6, %v866_v50, %v867_v52 }
 0x496   :  { %v884_v60 = vsel %vm197_vm4, %v883_v56, 0.0  ;;  %v881_v61 = vsel %vm205_vm3, %v877_v55, %v878_v51  ;;  %v882_v62 = vsel %vm205_vm3, %v876_v7, %v877_v55  ;;  %v869_v63 = vsel %vm693_vm6, %v865_v54, %v866_v50 }
 0x497   :  { %888 = vrot.lane.b32.xlu0 %v884_v60, %s2010_s2  ;;  %v870_v0 = vsel %vm693_vm6, %v864_v48, %v865_v54  ;;  %v886_v9 = vsel %vm199_vm5, %v881_v61, 0.0  ;;  %v872_v17 = vsel %vm685_vm7, %v871_v58, 0.0  ;;  %v874_v21 = vsel %vm687_vm8, %v869_v63, 0.0  ;;  %1745 = vmatpush3.bf16.msra.mxu1 %v1831_v40 }
 0x498   :  { %894 = vrot.lane.b32.xlu1 %v880_v57, %s2010_s2  ;;  %1746 = vmatprep.subr.bf16.mxu1 %v1832_v41 }
 0x49b   :  { %892 = vrot.lane.b32.xlu0 %v886_v9, %s2010_s2  ;;  %1747 = vmatpush3.bf16.msra.mxu1 %v1832_v41 }
 0x49c   :  { %890 = vrot.lane.b32.xlu1 %v882_v62, %s2010_s2  ;;  %1748 = vmatprep.subr.bf16.mxu1 %v1833_v5 }
 0x49f   :  { %904 = vrot.lane.b32.xlu0 %v862_v42, %s2011_s8  ;;  %1749 = vmatpush3.bf16.msra.mxu1 %v1833_v5  ;;  %v1493_v42 = vld [vmem:[%s2522_s12] ss:$0 sm:$0xff] }
 0x4a0   :  { %906 = vrot.lane.b32.xlu1 %v863_v47, %s2011_s8 }
 0x4ac   :  { %v2469_v10 = vpop.f32.mrb[8].mxu1 }
 0x4ad   :  { %v2471_v11 = vpop.f32.mrb[9].mxu1  ;;  %v1154_v48 = vadd.f32 %v2469_v10, %v1493_v42  ;;  %v1834_v10 = vld [vmem:[#allocation11 + $0x28] sm:$0xff]  }
 0x4ae   :  { %v2473_v12 = vpop.f32.mrb[10].mxu1  ;;  %v1146_v50 = vadd.f32 %v1493_v42, %v2471_v11  ;;  %1750 = vmatprep.subr.bf16.mxu1 %v1834_v10  ;;  %v1835_v11 = vld [vmem:[#allocation11 + $0x30] sm:$0xff]  }
 0x4af   :  { %v2475_v1 = vpop.f32.mrb[11].mxu1  ;;  %v1157_v53 = vadd.f32 %v2473_v12, %v1493_v42  ;;  %1751 = vmatpush3.bf16.msra.mxu1 %v1834_v10  ;;  %v1836_v12 = vld [vmem:[#allocation11 + $0x38] sm:$0xff]  }
 0x4b0   :  { %v1149_v56 = vadd.f32 %v1493_v42, %v2475_v1  ;;  %1752 = vmatprep.subr.bf16.mxu1 %v1835_v11  ;;  %v1502_v1 = vld [vmem:[%s2524_s14] ss:$0 sm:$0xff] }
 0x4b3   :  { %1753 = vmatpush3.bf16.msra.mxu1 %v1835_v11 }
 0x4b4   :  { %1754 = vmatprep.subr.bf16.mxu1 %v1836_v12 }
 0x4b7   :  { %1755 = vmatpush3.bf16.msra.mxu1 %v1836_v12 }
 0x504   :  { %v901_v13 = vpop.permute.xlu0 %900 }
 0x506   :  { %v903_v14 = vpop.permute.xlu1 %902 }
 0x509   :  { %v889_v15 = vpop.permute.xlu0 %888 }
 0x50a   :  { %v895_v16 = vpop.permute.xlu1 %894  ;;  %v896_v18 = vadd.f32 %v889_v15, %v872_v17 }
 0x50b   :  { %v899_v25 = vadd.f32 %v895_v16, %v868_v59 }
 0x50c   :  { %v908_v24 = vadd.f32 %v901_v13, %v896_v18 }
 0x50d   :  { %v893_v19 = vpop.permute.xlu0 %892 }
 0x50e   :  { %v891_v20 = vpop.permute.xlu1 %890  ;;  %v898_v23 = vadd.f32 %v893_v19, %v874_v21 }
 0x50f   :  { %v897_v22 = vadd.f32 %v891_v20, %v870_v0 }
 0x511   :  { %v909_v26 = vadd.f32 %v903_v14, %v897_v22  ;;  %v905_v27 = vpop.permute.xlu0 %904 }
 0x512   :  { %v910_v28 = vadd.f32 %v905_v27, %v898_v23  ;;  %v907_v29 = vpop.permute.xlu1 %906 }
 0x513   :  { %v911_v30 = vadd.f32 %v907_v29, %v899_v25  ;;  %v912_v31 = vpack.c.bf16 %v909_v26, %v908_v24 }
 0x515   :  { %v913_v32 = vpack.c.bf16 %v911_v30, %v910_v28  ;;  %1696 = vmatprep.mubr.bf16.mxu0 %v912_v31  ;;  %v1511_v31 = vld [vmem:[%s2526_s16] ss:$0 sm:$0xff] }
 0x517   :  { %1697 = vmatmul.mubr.bf16.vlgmr.msra.gmra.mrb[8].mxu0 %v913_v32 }
 0x518   :  { %1721 = vmatpush3.bf16.msra.mxu0 %v1821_v2 }
 0x519   :  { %1722 = vmatprep.subr.bf16.mxu0 %v1822_v3 }
 0x51c   :  { %1723 = vmatpush3.bf16.msra.mxu0 %v1822_v3 }
 0x51d   :  { %1724 = vmatprep.subr.bf16.mxu0 %v1823_v33 }
 0x520   :  { %1725 = vmatpush3.bf16.msra.mxu0 %v1823_v33 }
 0x521   :  { %1726 = vmatprep.subr.bf16.mxu0 %v1824_v4 }
 0x524   :  { %1727 = vmatpush3.bf16.msra.mxu0 %v1824_v4 }
 0x525   :  { %1728 = vmatprep.subr.bf16.mxu0 %v1825_v34 }
 0x528   :  { %1729 = vmatpush3.bf16.msra.mxu0 %v1825_v34 }
 0x529   :  { %1730 = vmatprep.subr.bf16.mxu0 %v1826_v35 }
 0x52c   :  { %1731 = vmatpush3.bf16.msra.mxu0 %v1826_v35 }
 0x52d   :  { %1732 = vmatprep.subr.bf16.mxu0 %v1827_v36 }
 0x530   :  { %1733 = vmatpush3.bf16.msra.mxu0 %v1827_v36 }
 0x531   :  { %1734 = vmatprep.subr.bf16.mxu0 %v1828_v37 }
 0x534   :  { %1735 = vmatpush3.bf16.msra.mxu0 %v1828_v37 }
 0x5ea   :  { %v1698_v43 = vpop.f32.mrb[8].mxu0 }
 0x5eb   :  { %v1028_v44 = vadd.f32 %v1698_v43, %v1484_v6  ;;  %v1019_v45 = vpop.f32.mrb[9].mxu0 }
 0x5ec   :  { %v1020_v46 = vadd.f32 %v1484_v6, %v1019_v45  ;;  %v1699_v47 = vpop.f32.mrb[10].mxu0 }
 0x5ed   :  { %v1036_v7 = vmax.f32 %v1028_v44, 0.0  ;;  %v1031_v8 = vadd.f32 %v1699_v47, %v1484_v6  ;;  %v1022_v49 = vpop.f32.mrb[11].mxu0 }
 0x5ee   :  { %v1034_v51 = vmax.f32 %v1020_v46, 0.0  ;;  %v1023_v52 = vadd.f32 %v1484_v6, %v1022_v49 }
 0x5ef   :  { %v1162_v54 = vadd.f32 %v1154_v48, %v1036_v7  ;;  %v1037_v55 = vmax.f32 %v1031_v8, 0.0 }
 0x5f0   :  { %v1160_v57 = vadd.f32 %v1146_v50, %v1034_v51  ;;  %v1035_v58 = vmax.f32 %v1023_v52, 0.0 }
 0x5f1   :  { %v1163_v59 = vadd.f32 %v1157_v53, %v1037_v55  ;;  %v1166_v61 = vmax.f32 %v1162_v54, 0.0 }
 0x5f2   :  { %v1161_v60 = vadd.f32 %v1149_v56, %v1035_v58  ;;  %v1164_v63 = vmax.f32 %v1160_v57, 0.0 }
 0x5f3   :  { %v1167_v62 = vmax.f32 %v1163_v59, 0.0 }
 0x5f4   :  { %v1165_v0 = vmax.f32 %v1161_v60, 0.0 }
 0x5f5   :  { %v1169_v2 = vpack.c.bf16 %v1167_v62, %v1166_v61 }
 0x5f6   :  { %v1168_v9 = vpack.c.bf16 %v1165_v0, %v1164_v63 }
 0x5f8   :  { %1736 = vmatprep.mubr.bf16.mxu0 %v1168_v9 }
 0x5f9   :  { %1737 = vmatmul.mubr.bf16.vlgmr.msra.gmra.mrb[12].mxu0 %v1169_v2 }
 0x6cc   :  { %v1738_v13 = vpop.f32.mrb[12].mxu0 }
 0x6cd   :  { %v1284_v14 = vadd.f32 %v1738_v13, %v1502_v1  ;;  %v1275_v15 = vpop.f32.mrb[13].mxu0 }
 0x6ce   :  { %v1276_v16 = vadd.f32 %v1502_v1, %v1275_v15  ;;  %v1739_v17 = vpop.f32.mrb[14].mxu0 }
 0x6cf   :  { %v1296_v18 = vmul.f32 0.01, %v1284_v14  ;;  %v1287_v19 = vadd.f32 %v1739_v17, %v1502_v1  ;;  %v1278_v20 = vpop.f32.mrb[15].mxu0  ;;  %vm1292_vm9 = vcmp.gt.f32.partialorder %v1284_v14, 0.0 }
 0x6d0   :  { %v1294_v21 = vmul.f32 0.01, %v1276_v16  ;;  %v1279_v22 = vadd.f32 %v1502_v1, %v1278_v20  ;;  %vm1290_vm10 = vcmp.gt.f32.partialorder %v1276_v16, 0.0 }
 0x6d1   :  { %vm1293_vm11 = vcmp.gt.f32.partialorder %v1287_v19, 0.0  ;;  %v1297_v23 = vmul.f32 0.01, %v1287_v19  ;;  %v1300_v25 = vsel %vm1292_vm9, %v1284_v14, %v1296_v18 }
 0x6d2   :  { %vm1291_vm12 = vcmp.gt.f32.partialorder %v1279_v22, 0.0  ;;  %v1295_v24 = vmul.f32 0.01, %v1279_v22  ;;  %v1298_v28 = vsel %vm1290_vm10, %v1276_v16, %v1294_v21 }
 0x6d3   :  { %v1301_v26 = vsel %vm1293_vm11, %v1287_v19, %v1297_v23 }
 0x6d4   :  { %v1303_v27 = vpack.c.bf16 %v1301_v26, %v1300_v25  ;;  %v1299_v29 = vsel %vm1291_vm12, %v1279_v22, %v1295_v24 }
 0x6d5   :  { %v1302_v30 = vpack.c.bf16 %v1299_v29, %v1298_v28 }
 0x6d7   :  { %1756 = vmatprep.mubr.bf16.mxu1 %v1302_v30 }
 0x6d8   :  { %1757 = vmatmul.mubr.bf16.vlgmr.msra.gmra.mrb[12].mxu1 %v1303_v27 }
 0x7ab   :  { %v1758_v32 = vpop.f32.mrb[12].mxu1 }
 0x7ac   :  { %v1418_v3 = vadd.f32 %v1758_v32, %v1511_v31  ;;  %v1409_v33 = vpop.f32.mrb[13].mxu1 }
 0x7ad   :  { %v1410_v4 = vadd.f32 %v1511_v31, %v1409_v33  ;;  %v1759_v34 = vpop.f32.mrb[14].mxu1 }
 0x7ae   :  { %1426 = vst [vmem:[#allocation13 + $0x10] sm:$0xff] %v1418_v3  ;;  %v1421_v35 = vadd.f32 %v1759_v34, %v1511_v31  ;;  %v1412_v36 = vpop.f32.mrb[15].mxu1 }
 0x7af   :  { %1424 = vst [vmem:[#allocation13] sm:$0xff] %v1410_v4  ;;  %v1413_v37 = vadd.f32 %v1511_v31, %v1412_v36 }
 0x7b0   :  { %1427 = vst [vmem:[#allocation13 + $0x18] sm:$0xff] %v1421_v35 }
 0x7b1   :  { %1425 = vst [vmem:[#allocation13 + $0x8] sm:$0xff] %v1413_v37 }
 0x7b2   :  { %1980 = shalt.err (!%p1977_p10)
}
 0x7b3   :  { %s1981_s20 = scalar_lea.hbm %s2527_s17, 512 }
 0x7b4   :  { %p1982_p11 = scmp.ne.s32.totalorder %s2527_s17, %s1981_s20  ;;  %p1985_p12 = scmp.lt.u32.totalorder %s1981_s20, %s2527_s17 }
 0x7b6   :  { %p1987_p13 = pnand %p1985_p12, %p1982_p11 }
 0x7b8   :  { %1990 = shalt.err (!%p1987_p13)
}
 0x7b9   :  { %s2013_s21 = smov 128  }
 0x7ba   :  { %1439 = dma.vmem_to_hbm [thread:$0]  %s1434_s11, 512, %s2527_s17, [#allocation4], %s2013_s21, %s2013_s21, %s2009_s9  }
 0x7bb   :  { %1999 = dma.done.wait [#allocation4], 512  }
 0x7bc   :  { %2000 = vsyncadd [#allocation4], 4294966784 }
 0x7bd   :  { %1443 = vsyncpa [#allocation3], 1 }
 0x7be   :  { %1444 = vsyncpa [#allocation6], 1 }
 0x7bf   :  { %1445 = vsyncpa [#allocation9], 1 }
 0x7c0   :  { %1446 = vsyncpa [#allocation12], 1 }
 0x7c1   :  { %1447 = vsyncpa [#allocation4], 1 }

</bundles_post_ra>
